<compile_context>
chip_gen: v7x
topology: tpu7x:2x2x1
jax: 0.10.0
libtpu: 0.0.40
codegen_flags: <defaults>
</compile_context>

<pallas_src>
import functools
import math

import jax
import jax.numpy as jnp
import numpy as np
from jax.experimental import pallas as pl
from jax.experimental.pallas import tpu as pltpu


def _round_up(x, m):
    return ((x + m - 1) // m) * m


def make_divisible(x, divisor):
    return math.ceil(x / divisor) * divisor


# ---------------------------------------------------------------------------
# Fused whole-module kernel.
# ---------------------------------------------------------------------------
def _rcsosa_kernel(x_ref, mb_ref, w1_ref, *rest, n_sr1, n_sr2, c_, W):
    """Fused RCSOSA forward for one (Bt-batch) tile.

    x_ref  : (cp1, N)        input, channels zero-padded to a sublane multiple,
                             N = Bt*H*W images concatenated on the lane axis.
    mb_ref : (9*8 + 8, N)    per-tap boundary masks pre-broadcast to 8 sublanes,
                             followed by the [ones; zeros*7] bias block.
    w1_ref : (c_, 9*cp1+8)   fused conv1 weight (+bias column).
    rest   : SR weights (ch, 9*c_+8) * (n_sr1+n_sr2), conv3 weight
             (c2, 27*c_+8), then o_ref (c2, N), p_ref (K_max, N) patch scratch,
             t_ref (c_, N) channel-shuffle scratch.
    """
    n_sr = n_sr1 + n_sr2
    wsr_refs = rest[:n_sr]
    w3_ref, o_ref, p_ref, t_ref = rest[n_sr:n_sr + 4]

    N = x_ref.shape[1]
    ch = c_ // 2

    # [1;0;...;0] bias block (last 8 rows of the resident constant).
    bias_blk = mb_ref[pl.ds(9 * 8, 8), :]

    def conv(sources, w_ref):
        """3x3 'same' conv + bias + SiLU as ONE MXU matmul.

        sources: list of (c_j, N) f32 values with c_j % 8 == 0; the conv input
        is their channel concatenation.  Taps are built with XLU lane rolls +
        resident boundary masks into the patch scratch; every store is a full
        8-sublane-aligned block, and every row read by the matmul is written
        in this same call (no stale-row / init hazard)."""
        counts = [int(s.shape[0]) for s in sources]
        stride = sum(counts)                     # per-tap row stride (mult of 8)
        k = 0
        for oy in (-1, 0, 1):
            for ox in (-1, 0, 1):
                off = oy * W + ox
                m8 = None if off == 0 else mb_ref[pl.ds(k * 8, 8), :]
                r0 = 0
                for s, c in zip(sources, counts):
                    if off == 0:
                        t = s                    # center tap, mask == 1
                    else:
                        m = m8 if c == 8 else jnp.concatenate([m8] * (c // 8), axis=0)
                        # rolled[p] = s[(p + off) mod N]; positions whose source
                        # falls outside the image (incl. cross-image wrap) are
                        # exactly the mask zeros.
                        t = pltpu.roll(s, (-off) % N, axis=1) * m
                    p_ref[pl.ds(k * stride + r0, c), :] = t
                    r0 += c
                k += 1
        p_ref[pl.ds(9 * stride, 8), :] = bias_blk
        kdim = 9 * stride + 8
        acc = jnp.dot(w_ref[...], p_ref[pl.ds(0, kdim), :],
                      preferred_element_type=jnp.float32)    # (Cout, N)
        return acc * jax.nn.sigmoid(acc)                     # SiLU

    def sr(x, w_ref):
        """SR block: conv the second channel half (first half masked by zero
        weight columns), then cat + channel_shuffle(groups=2) == channel
        interleave, materialized via row stores into the t_ref scratch."""
        y = conv([x], w_ref)                                 # (ch, N)
        for i in range(ch):
            t_ref[pl.ds(2 * i, 1), :] = x[i:i + 1, :]
            t_ref[pl.ds(2 * i + 1, 1), :] = y[i:i + 1, :]
        return t_ref[...]                                    # (c_, N)

    xin = x_ref[...].astype(jnp.float32)                     # (cp1, N)
    x1 = conv([xin], w1_ref)                                 # (c_, N)
    x2 = x1
    for j in range(n_sr1):
        x2 = sr(x2, wsr_refs[j])
    x3 = x2
    for j in range(n_sr2):
        x3 = sr(x3, wsr_refs[n_sr1 + j])
    # OSA concat fused: x1/x2/x3 packed side by side into the patch matrix.
    out = conv([x1, x2, x3], w3_ref)                         # (c2, N)
    o_ref[...] = out.astype(o_ref.dtype)


# ---------------------------------------------------------------------------
# Resident constants: boundary masks (pre-broadcast to 8 sublanes) + bias block.
# ---------------------------------------------------------------------------
def _mask_bias_const(H, W, Bt):
    HW = H * W
    idx = np.arange(HW)
    hh, ww = idx // W, idx % W
    rows = []
    for oy in (-1, 0, 1):
        for ox in (-1, 0, 1):
            valid = ((hh + oy >= 0) & (hh + oy < H) &
                     (ww + ox >= 0) & (ww + ox < W)).astype(np.float32)
            rows.append(np.broadcast_to(valid[None, :], (8, HW)))
    m = np.concatenate(rows, axis=0)          # (72, HW): 8 sublanes per tap
    m = np.tile(m, (1, Bt))                   # tile per image packed on lanes
    bias_blk = np.zeros((8, Bt * HW), np.float32)
    bias_blk[0, :] = 1.0
    return jnp.asarray(np.concatenate([m, bias_blk], axis=0))  # (80, Bt*HW)


# ---------------------------------------------------------------------------
# Weight packing: OIHW (+bias) -> (Cout, 9*stride + 8) fused matrix whose
# column layout matches the kernel's patch-row layout (tap-major, per-source
# channel blocks padded to 8 rows, bias column at 9*stride, zero tail).
# ---------------------------------------------------------------------------
def pack_fused_weight(kernel_oihw, bias, src_channels):
    cout, cin = kernel_oihw.shape[:2]
    assert sum(src_channels) == cin
    cpads = [_round_up(c, 8) for c in src_channels]
    stride = sum(cpads)
    K = 9 * stride + 8
    w = jnp.zeros((cout, K), jnp.float32)
    ci0, r0 = 0, 0
    for c, cp in zip(src_channels, cpads):
        blk = jnp.transpose(kernel_oihw[:, ci0:ci0 + c], (0, 2, 3, 1))
        blk = blk.reshape(cout, 9, c)         # tap k = 3*ky + kx
        for k in range(9):
            w = w.at[:, k * stride + r0:k * stride + r0 + c].set(blk[:, k, :])
        ci0 += c
        r0 += cp
    w = w.at[:, 9 * stride].set(bias)
    return w


def pack_sr_weight(kernel_oihw, bias, c_):
    """SR's repconv acts on the SECOND channel half of its c_-channel input.
    Absorb the chunk into zero weight columns so the kernel can consume the
    full activation with no in-kernel channel slicing/padding."""
    ch = c_ // 2
    kfull = jnp.zeros((ch, c_, 3, 3), jnp.float32).at[:, ch:].set(kernel_oihw)
    return pack_fused_weight(kfull, bias, [c_])


# ---------------------------------------------------------------------------
# Pallas forward wrapper.
# ---------------------------------------------------------------------------
def rcsosa_forward_pallas(x_nchw, params, batch_tile=None):
    B, C1, H, W = x_nchw.shape
    HW = H * W
    assert HW % 128 == 0, "flattened spatial axis must be a multiple of 128 lanes"
    c_ = params["c_"]
    assert c_ % 8 == 0
    ch = c_ // 2
    c2 = params["conv3"][0].shape[0]
    sr_params = list(params["sr1"]) + list(params["sr2"])

    if batch_tile is None:  # pack several images per grid step to fatten N
        batch_tile = next(bt for bt in (8, 4, 2, 1) if B % bt == 0)
    Bt = batch_tile
    assert B % Bt == 0
    N = Bt * HW

    cp1 = _round_up(C1, 8)
    K1 = 9 * cp1 + 8
    Ks = 9 * c_ + 8
    K3 = 9 * 3 * c_ + 8
    K_max = max(K1, Ks, K3)

    w1 = pack_fused_weight(*params["conv1"], [C1])
    wsr = [pack_sr_weight(k, b, c_) for (k, b) in sr_params]
    w3 = pack_fused_weight(*params["conv3"], [c_, c_, c_])
    mb = _mask_bias_const(H, W, Bt)

    # Lane-dense layout: (C, B*HW); pad channels to a sublane multiple in HBM.
    x2d = x_nchw.reshape(B, C1, HW).transpose(1, 0, 2).reshape(C1, B * HW)
    if cp1 > C1:
        x2d = jnp.concatenate(
            [x2d, jnp.zeros((cp1 - C1, B * HW), x2d.dtype)], axis=0)

    kernel = functools.partial(
        _rcsosa_kernel, n_sr1=len(params["sr1"]), n_sr2=len(params["sr2"]),
        c_=c_, W=W)

    nm = 9 * 8 + 8
    in_specs = [
        pl.BlockSpec((cp1, N), lambda b: (0, b)),          # input tile
        pl.BlockSpec((nm, N), lambda b: (0, 0)),           # resident masks+bias
        pl.BlockSpec((c_, K1), lambda b: (0, 0)),          # resident conv1 w
    ]
    in_specs += [pl.BlockSpec((ch, Ks), lambda b: (0, 0)) for _ in wsr]
    in_specs += [pl.BlockSpec((c2, K3), lambda b: (0, 0))]  # resident conv3 w

    out2d = pl.pallas_call(
        kernel,
        out_shape=jax.ShapeDtypeStruct((c2, B * HW), x_nchw.dtype),
        grid=(B // Bt,),
        in_specs=in_specs,
        out_specs=pl.BlockSpec((c2, N), lambda b: (0, b)),
        scratch_shapes=[pltpu.VMEM((K_max, N), jnp.float32),   # patch matrix
                        pltpu.VMEM((c_, N), jnp.float32)],     # shuffle buffer
        compiler_params=pltpu.CompilerParams(
            dimension_semantics=("parallel",),
            # tiny at these shapes; explicit so larger configs are budgeted
            # against v7x's 64 MiB physical VMEM (raise on v5e/v6e if needed).
            vmem_limit_bytes=32 * 1024 * 1024,
        ),
    )(x2d, mb, w1, *wsr, w3)

    return out2d.reshape(c2, B, HW).transpose(1, 0, 2).reshape(B, c2, H, W)


# ---------------------------------------------------------------------------
# Pure-JAX reference (eval-mode, BN folded) for validation.
# ---------------------------------------------------------------------------
def _repvgg_ref(x, kb):
    k, b = kb
    y = jax.lax.conv_general_dilated(
        x, k, (1, 1), "SAME", dimension_numbers=("NCHW", "OIHW", "NCHW"))
    y = y + b[None, :, None, None]
    return y * jax.nn.sigmoid(y)


def _sr_ref(x, kb):
    B, C, H, W = x.shape
    ch = C // 2
    y = _repvgg_ref(x[:, ch:], kb)
    out = jnp.concatenate([x[:, :ch], y], axis=1)
    return (out.reshape(B, 2, ch, H, W).transpose(0, 2, 1, 3, 4)
               .reshape(B, C, H, W))                 # channel_shuffle(groups=2)


def rcsosa_forward_ref(x, params):
    x1 = _repvgg_ref(x, params["conv1"])
    x2 = x1
    for kb in params["sr1"]:
        x2 = _sr_ref(x2, kb)
    x3 = x2
    for kb in params["sr2"]:
        x3 = _sr_ref(x3, kb)
    return _repvgg_ref(jnp.concatenate([x1, x2, x3], axis=1), params["conv3"])


# ---------------------------------------------------------------------------
# Parameter construction (deterministic, eval-mode BN folded; 3-branch RepVGG
# collapsed into a single 3x3 kernel + bias exactly like get_equivalent_kernel_bias).
# ---------------------------------------------------------------------------
def _bn_init(key, nf):
    k1, k2, k3, k4 = jax.random.split(key, 4)
    gamma = jax.random.uniform(k1, (nf,), minval=0.8, maxval=1.2)
    beta = jax.random.uniform(k2, (nf,), minval=-0.1, maxval=0.1)
    mean = jax.random.uniform(k3, (nf,), minval=-0.1, maxval=0.1)
    var = jax.random.uniform(k4, (nf,), minval=0.5, maxval=1.5)
    return gamma, beta, mean, var


def _fuse_conv_bn(kernel_oihw, gamma, beta, mean, var, eps=1e-5):
    std = jnp.sqrt(var + eps)
    t = gamma / std
    return kernel_oihw * t[:, None, None, None], beta - mean * t


def init_repvgg(key, cin, cout):
    k3w, k3bn, k1w, k1bn, kidbn = jax.random.split(key, 5)

    bound3 = 1.0 / math.sqrt(cin * 9)
    w3 = jax.random.uniform(k3w, (cout, cin, 3, 3), minval=-bound3, maxval=bound3)
    k3f, b3f = _fuse_conv_bn(w3, *_bn_init(k3bn, cout))

    bound1 = 1.0 / math.sqrt(cin)
    w1 = jax.random.uniform(k1w, (cout, cin, 1, 1), minval=-bound1, maxval=bound1)
    w1p = jnp.pad(w1, ((0, 0), (0, 0), (1, 1), (1, 1)))   # _pad_1x1_to_3x3_tensor
    k1f, b1f = _fuse_conv_bn(w1p, *_bn_init(k1bn, cout))

    kernel = k3f + k1f
    bias = b3f + b1f

    if cin == cout:  # identity (BatchNorm) branch
        idk = jnp.zeros((cin, cin, 3, 3), jnp.float32)
        idk = idk.at[jnp.arange(cin), jnp.arange(cin), 1, 1].set(1.0)
        kidf, bidf = _fuse_conv_bn(idk, *_bn_init(kidbn, cin))
        kernel = kernel + kidf
        bias = bias + bidf

    return kernel.astype(jnp.float32), bias.astype(jnp.float32)


def init_rcsosa(key, c1, c2, n=1, e=0.5):
    c_ = make_divisible(int(c1 * e), 8)
    n_ = n // 2
    keys = jax.random.split(key, 2 + 2 * n_)
    return {
        "c_": c_,
        "conv1": init_repvgg(keys[0], c1, c_),
        "conv3": init_repvgg(keys[1], 3 * c_, c2),
        "sr1": [init_repvgg(keys[2 + i], c_ // 2, c_ // 2) for i in range(n_)],
        "sr2": [init_repvgg(keys[2 + n_ + i], c_ // 2, c_ // 2) for i in range(n_)],
    }


# ---------------------------------------------------------------------------
if __name__ == "__main__":
    key = jax.random.PRNGKey(0)
    kx, kp = jax.random.split(key)

    B, c1, c2, H, W = 2, 4, 8, 16, 16
    n = 2  # n_ = 1 -> one SR block in each of sr1/sr2 (exercises shuffle path)

    x = jax.random.normal(kx, (B, c1, H, W), jnp.float32)
    params = init_rcsosa(kp, c1, c2, n=n)

    fwd = jax.jit(lambda xi: rcsosa_forward_pallas(xi, params))
    out = jax.block_until_ready(fwd(x))

    ref = rcsosa_forward_ref(x, params)
    assert out.shape == (B, c2, H, W), out.shape
    err = float(jnp.max(jnp.abs(out - ref)))
    assert jnp.allclose(out, ref, atol=2e-3, rtol=2e-3), err

    print("KERNEL_OK")
</pallas_src>

<mosaic_0001>
module attributes {stable_mosaic.version = 11 : i64} {
  func.func @_rcsosa_kernel(%arg0: i32, %arg1: memref<8x512xf32, #tpu.memory_space<vmem>>, %arg2: memref<80x512xf32, #tpu.memory_space<vmem>>, %arg3: memref<8x80xf32, #tpu.memory_space<vmem>>, %arg4: memref<4x80xf32, #tpu.memory_space<vmem>>, %arg5: memref<4x80xf32, #tpu.memory_space<vmem>>, %arg6: memref<8x224xf32, #tpu.memory_space<vmem>>, %arg7: memref<8x512xf32, #tpu.memory_space<vmem>>, %arg8: memref<224x512xf32, #tpu.memory_space<vmem>>, %arg9: memref<8x512xf32, #tpu.memory_space<vmem>>) attributes {dimension_semantics = [#tpu.dimension_semantics<parallel>], iteration_bounds = array<i64: 1>, scalar_prefetch = 0 : i64, scratch_operands = 2 : i64, tpu.core_type = #tpu.core_type<tc>, window_params = [{transform_indices = @transform_0, window_bounds = array<i64: 8, 512>}, {pipeline_mode = #tpu.pipeline_mode<synchronous>, transform_indices = @transform_1, window_bounds = array<i64: 80, 512>}, {pipeline_mode = #tpu.pipeline_mode<synchronous>, transform_indices = @transform_2, window_bounds = array<i64: 8, 80>}, {pipeline_mode = #tpu.pipeline_mode<synchronous>, transform_indices = @transform_3, window_bounds = array<i64: 4, 80>}, {pipeline_mode = #tpu.pipeline_mode<synchronous>, transform_indices = @transform_4, window_bounds = array<i64: 4, 80>}, {pipeline_mode = #tpu.pipeline_mode<synchronous>, transform_indices = @transform_5, window_bounds = array<i64: 8, 224>}, {transform_indices = @transform_6, window_bounds = array<i64: 8, 512>}]} {
    %c72 = arith.constant 72 : index
    %c0 = arith.constant 0 : index
    %0 = vector.load %arg2[%c72, %c0] : memref<80x512xf32, #tpu.memory_space<vmem>>, vector<8x512xf32>
    %c0_0 = arith.constant 0 : index
    %c0_1 = arith.constant 0 : index
    %1 = vector.load %arg1[%c0_0, %c0_1] : memref<8x512xf32, #tpu.memory_space<vmem>>, vector<8x512xf32>
    %c0_2 = arith.constant 0 : index
    %c0_3 = arith.constant 0 : index
    %2 = vector.load %arg2[%c0_2, %c0_3] : memref<80x512xf32, #tpu.memory_space<vmem>>, vector<8x512xf32>
    %c17_i32 = arith.constant 17 : i32
    %3 = tpu.dynamic_rotate %1 by %c17_i32 dim 1 : vector<8x512xf32>, i32 -> vector<8x512xf32>
    %4 = arith.mulf %3, %2 : vector<8x512xf32>
    %c0_4 = arith.constant 0 : index
    %c0_5 = arith.constant 0 : index
    %5 = vector.load %arg8[%c0_4, %c0_5] : memref<224x512xf32, #tpu.memory_space<vmem>>, vector<8x512xf32>
    tpu.vector_store %arg8[%c0_4, %c0_5], %4 {strides = array<i32>} : memref<224x512xf32, #tpu.memory_space<vmem>>, vector<8x512xf32>,
    %c8 = arith.constant 8 : index
    %c0_6 = arith.constant 0 : index
    %6 = vector.load %arg2[%c8, %c0_6] : memref<80x512xf32, #tpu.memory_space<vmem>>, vector<8x512xf32>
    %c16_i32 = arith.constant 16 : i32
    %7 = tpu.dynamic_rotate %1 by %c16_i32 dim 1 : vector<8x512xf32>, i32 -> vector<8x512xf32>
    %8 = arith.mulf %7, %6 : vector<8x512xf32>
    %c8_7 = arith.constant 8 : index
    %c0_8 = arith.constant 0 : index
    %9 = vector.load %arg8[%c8_7, %c0_8] : memref<224x512xf32, #tpu.memory_space<vmem>>, vector<8x512xf32>
    tpu.vector_store %arg8[%c8_7, %c0_8], %8 {strides = array<i32>} : memref<224x512xf32, #tpu.memory_space<vmem>>, vector<8x512xf32>,
    %c16 = arith.constant 16 : index
    %c0_9 = arith.constant 0 : index
    %10 = vector.load %arg2[%c16, %c0_9] : memref<80x512xf32, #tpu.memory_space<vmem>>, vector<8x512xf32>
    %c15_i32 = arith.constant 15 : i32
    %11 = tpu.dynamic_rotate %1 by %c15_i32 dim 1 : vector<8x512xf32>, i32 -> vector<8x512xf32>
    %12 = arith.mulf %11, %10 : vector<8x512xf32>
    %c16_10 = arith.constant 16 : index
    %c0_11 = arith.constant 0 : index
    %13 = vector.load %arg8[%c16_10, %c0_11] : memref<224x512xf32, #tpu.memory_space<vmem>>, vector<8x512xf32>
    tpu.vector_store %arg8[%c16_10, %c0_11], %12 {strides = array<i32>} : memref<224x512xf32, #tpu.memory_space<vmem>>, vector<8x512xf32>,
    %c24 = arith.constant 24 : index
    %c0_12 = arith.constant 0 : index
    %14 = vector.load %arg2[%c24, %c0_12] : memref<80x512xf32, #tpu.memory_space<vmem>>, vector<8x512xf32>
    %c1_i32 = arith.constant 1 : i32
    %15 = tpu.dynamic_rotate %1 by %c1_i32 dim 1 : vector<8x512xf32>, i32 -> vector<8x512xf32>
    %16 = arith.mulf %15, %14 : vector<8x512xf32>
    %c24_13 = arith.constant 24 : index
    %c0_14 = arith.constant 0 : index
    %17 = vector.load %arg8[%c24_13, %c0_14] : memref<224x512xf32, #tpu.memory_space<vmem>>, vector<8x512xf32>
    tpu.vector_store %arg8[%c24_13, %c0_14], %16 {strides = array<i32>} : memref<224x512xf32, #tpu.memory_space<vmem>>, vector<8x512xf32>,
    %c32 = arith.constant 32 : index
    %c0_15 = arith.constant 0 : index
    %18 = vector.load %arg8[%c32, %c0_15] : memref<224x512xf32, #tpu.memory_space<vmem>>, vector<8x512xf32>
    tpu.vector_store %arg8[%c32, %c0_15], %1 {strides = array<i32>} : memref<224x512xf32, #tpu.memory_space<vmem>>, vector<8x512xf32>,
    %c40 = arith.constant 40 : index
    %c0_16 = arith.constant 0 : index
    %19 = vector.load %arg2[%c40, %c0_16] : memref<80x512xf32, #tpu.memory_space<vmem>>, vector<8x512xf32>
    %c511_i32 = arith.constant 511 : i32
    %20 = tpu.dynamic_rotate %1 by %c511_i32 dim 1 : vector<8x512xf32>, i32 -> vector<8x512xf32>
    %21 = arith.mulf %20, %19 : vector<8x512xf32>
    %c40_17 = arith.constant 40 : index
    %c0_18 = arith.constant 0 : index
    %22 = vector.load %arg8[%c40_17, %c0_18] : memref<224x512xf32, #tpu.memory_space<vmem>>, vector<8x512xf32>
    tpu.vector_store %arg8[%c40_17, %c0_18], %21 {strides = array<i32>} : memref<224x512xf32, #tpu.memory_space<vmem>>, vector<8x512xf32>,
    %c48 = arith.constant 48 : index
    %c0_19 = arith.constant 0 : index
    %23 = vector.load %arg2[%c48, %c0_19] : memref<80x512xf32, #tpu.memory_space<vmem>>, vector<8x512xf32>
    %c497_i32 = arith.constant 497 : i32
    %24 = tpu.dynamic_rotate %1 by %c497_i32 dim 1 : vector<8x512xf32>, i32 -> vector<8x512xf32>
    %25 = arith.mulf %24, %23 : vector<8x512xf32>
    %c48_20 = arith.constant 48 : index
    %c0_21 = arith.constant 0 : index
    %26 = vector.load %arg8[%c48_20, %c0_21] : memref<224x512xf32, #tpu.memory_space<vmem>>, vector<8x512xf32>
    tpu.vector_store %arg8[%c48_20, %c0_21], %25 {strides = array<i32>} : memref<224x512xf32, #tpu.memory_space<vmem>>, vector<8x512xf32>,
    %c56 = arith.constant 56 : index
    %c0_22 = arith.constant 0 : index
    %27 = vector.load %arg2[%c56, %c0_22] : memref<80x512xf32, #tpu.memory_space<vmem>>, vector<8x512xf32>
    %c496_i32 = arith.constant 496 : i32
    %28 = tpu.dynamic_rotate %1 by %c496_i32 dim 1 : vector<8x512xf32>, i32 -> vector<8x512xf32>
    %29 = arith.mulf %28, %27 : vector<8x512xf32>
    %c56_23 = arith.constant 56 : index
    %c0_24 = arith.constant 0 : index
    %30 = vector.load %arg8[%c56_23, %c0_24] : memref<224x512xf32, #tpu.memory_space<vmem>>, vector<8x512xf32>
    tpu.vector_store %arg8[%c56_23, %c0_24], %29 {strides = array<i32>} : memref<224x512xf32, #tpu.memory_space<vmem>>, vector<8x512xf32>,
    %c64 = arith.constant 64 : index
    %c0_25 = arith.constant 0 : index
    %31 = vector.load %arg2[%c64, %c0_25] : memref<80x512xf32, #tpu.memory_space<vmem>>, vector<8x512xf32>
    %c495_i32 = arith.constant 495 : i32
    %32 = tpu.dynamic_rotate %1 by %c495_i32 dim 1 : vector<8x512xf32>, i32 -> vector<8x512xf32>
    %33 = arith.mulf %32, %31 : vector<8x512xf32>
    %c64_26 = arith.constant 64 : index
    %c0_27 = arith.constant 0 : index
    %34 = vector.load %arg8[%c64_26, %c0_27] : memref<224x512xf32, #tpu.memory_space<vmem>>, vector<8x512xf32>
    tpu.vector_store %arg8[%c64_26, %c0_27], %33 {strides = array<i32>} : memref<224x512xf32, #tpu.memory_space<vmem>>, vector<8x512xf32>,
    %c72_28 = arith.constant 72 : index
    %c0_29 = arith.constant 0 : index
    %35 = vector.load %arg8[%c72_28, %c0_29] : memref<224x512xf32, #tpu.memory_space<vmem>>, vector<8x512xf32>
    tpu.vector_store %arg8[%c72_28, %c0_29], %0 {strides = array<i32>} : memref<224x512xf32, #tpu.memory_space<vmem>>, vector<8x512xf32>,
    %c0_30 = arith.constant 0 : index
    %c0_31 = arith.constant 0 : index
    %36 = vector.load %arg3[%c0_30, %c0_31] : memref<8x80xf32, #tpu.memory_space<vmem>>, vector<8x80xf32>
    %c0_32 = arith.constant 0 : index
    %c0_33 = arith.constant 0 : index
    %37 = vector.load %arg8[%c0_32, %c0_33] : memref<224x512xf32, #tpu.memory_space<vmem>>, vector<80x512xf32>
    %cst = arith.constant dense<0.000000e+00> : vector<8x512xf32>
    %38 = tpu.matmul %36, %37, %cst {dimension_numbers = #tpu.dot_dimension_numbers<[1], [0], [0], [1], [0, 0, 1, 1], [], []>} : vector<8x80xf32>, vector<80x512xf32>, vector<8x512xf32> -> vector<8x512xf32>
    %39 = arith.negf %38 : vector<8x512xf32>
    %40 = math.exp %39 : vector<8x512xf32>
    %cst_34 = arith.constant 1.000000e+00 : f32
    %41 = vector.broadcast %cst_34 : f32 to vector<8x512xf32>
    %42 = arith.addf %41, %40 : vector<8x512xf32>
    %43 = arith.divf %41, %42 : vector<8x512xf32>
    %44 = arith.mulf %38, %43 : vector<8x512xf32>
    %c0_35 = arith.constant 0 : index
    %c0_36 = arith.constant 0 : index
    %45 = vector.load %arg2[%c0_35, %c0_36] : memref<80x512xf32, #tpu.memory_space<vmem>>, vector<8x512xf32>
    %c17_i32_37 = arith.constant 17 : i32
    %46 = tpu.dynamic_rotate %44 by %c17_i32_37 dim 1 : vector<8x512xf32>, i32 -> vector<8x512xf32>
    %47 = arith.mulf %46, %45 : vector<8x512xf32>
    %c0_38 = arith.constant 0 : index
    %c0_39 = arith.constant 0 : index
    %48 = vector.load %arg8[%c0_38, %c0_39] : memref<224x512xf32, #tpu.memory_space<vmem>>, vector<8x512xf32>
    tpu.vector_store %arg8[%c0_38, %c0_39], %47 {strides = array<i32>} : memref<224x512xf32, #tpu.memory_space<vmem>>, vector<8x512xf32>,
    %c8_40 = arith.constant 8 : index
    %c0_41 = arith.constant 0 : index
    %49 = vector.load %arg2[%c8_40, %c0_41] : memref<80x512xf32, #tpu.memory_space<vmem>>, vector<8x512xf32>
    %c16_i32_42 = arith.constant 16 : i32
    %50 = tpu.dynamic_rotate %44 by %c16_i32_42 dim 1 : vector<8x512xf32>, i32 -> vector<8x512xf32>
    %51 = arith.mulf %50, %49 : vector<8x512xf32>
    %c8_43 = arith.constant 8 : index
    %c0_44 = arith.constant 0 : index
    %52 = vector.load %arg8[%c8_43, %c0_44] : memref<224x512xf32, #tpu.memory_space<vmem>>, vector<8x512xf32>
    tpu.vector_store %arg8[%c8_43, %c0_44], %51 {strides = array<i32>} : memref<224x512xf32, #tpu.memory_space<vmem>>, vector<8x512xf32>,
    %c16_45 = arith.constant 16 : index
    %c0_46 = arith.constant 0 : index
    %53 = vector.load %arg2[%c16_45, %c0_46] : memref<80x512xf32, #tpu.memory_space<vmem>>, vector<8x512xf32>
    %c15_i32_47 = arith.constant 15 : i32
    %54 = tpu.dynamic_rotate %44 by %c15_i32_47 dim 1 : vector<8x512xf32>, i32 -> vector<8x512xf32>
    %55 = arith.mulf %54, %53 : vector<8x512xf32>
    %c16_48 = arith.constant 16 : index
    %c0_49 = arith.constant 0 : index
    %56 = vector.load %arg8[%c16_48, %c0_49] : memref<224x512xf32, #tpu.memory_space<vmem>>, vector<8x512xf32>
    tpu.vector_store %arg8[%c16_48, %c0_49], %55 {strides = array<i32>} : memref<224x512xf32, #tpu.memory_space<vmem>>, vector<8x512xf32>,
    %c24_50 = arith.constant 24 : index
    %c0_51 = arith.constant 0 : index
    %57 = vector.load %arg2[%c24_50, %c0_51] : memref<80x512xf32, #tpu.memory_space<vmem>>, vector<8x512xf32>
    %c1_i32_52 = arith.constant 1 : i32
    %58 = tpu.dynamic_rotate %44 by %c1_i32_52 dim 1 : vector<8x512xf32>, i32 -> vector<8x512xf32>
    %59 = arith.mulf %58, %57 : vector<8x512xf32>
    %c24_53 = arith.constant 24 : index
    %c0_54 = arith.constant 0 : index
    %60 = vector.load %arg8[%c24_53, %c0_54] : memref<224x512xf32, #tpu.memory_space<vmem>>, vector<8x512xf32>
    tpu.vector_store %arg8[%c24_53, %c0_54], %59 {strides = array<i32>} : memref<224x512xf32, #tpu.memory_space<vmem>>, vector<8x512xf32>,
    %c32_55 = arith.constant 32 : index
    %c0_56 = arith.constant 0 : index
    %61 = vector.load %arg8[%c32_55, %c0_56] : memref<224x512xf32, #tpu.memory_space<vmem>>, vector<8x512xf32>
    tpu.vector_store %arg8[%c32_55, %c0_56], %44 {strides = array<i32>} : memref<224x512xf32, #tpu.memory_space<vmem>>, vector<8x512xf32>,
    %c40_57 = arith.constant 40 : index
    %c0_58 = arith.constant 0 : index
    %62 = vector.load %arg2[%c40_57, %c0_58] : memref<80x512xf32, #tpu.memory_space<vmem>>, vector<8x512xf32>
    %c511_i32_59 = arith.constant 511 : i32
    %63 = tpu.dynamic_rotate %44 by %c511_i32_59 dim 1 : vector<8x512xf32>, i32 -> vector<8x512xf32>
    %64 = arith.mulf %63, %62 : vector<8x512xf32>
    %c40_60 = arith.constant 40 : index
    %c0_61 = arith.constant 0 : index
    %65 = vector.load %arg8[%c40_60, %c0_61] : memref<224x512xf32, #tpu.memory_space<vmem>>, vector<8x512xf32>
    tpu.vector_store %arg8[%c40_60, %c0_61], %64 {strides = array<i32>} : memref<224x512xf32, #tpu.memory_space<vmem>>, vector<8x512xf32>,
    %c48_62 = arith.constant 48 : index
    %c0_63 = arith.constant 0 : index
    %66 = vector.load %arg2[%c48_62, %c0_63] : memref<80x512xf32, #tpu.memory_space<vmem>>, vector<8x512xf32>
    %c497_i32_64 = arith.constant 497 : i32
    %67 = tpu.dynamic_rotate %44 by %c497_i32_64 dim 1 : vector<8x512xf32>, i32 -> vector<8x512xf32>
    %68 = arith.mulf %67, %66 : vector<8x512xf32>
    %c48_65 = arith.constant 48 : index
    %c0_66 = arith.constant 0 : index
    %69 = vector.load %arg8[%c48_65, %c0_66] : memref<224x512xf32, #tpu.memory_space<vmem>>, vector<8x512xf32>
    tpu.vector_store %arg8[%c48_65, %c0_66], %68 {strides = array<i32>} : memref<224x512xf32, #tpu.memory_space<vmem>>, vector<8x512xf32>,
    %c56_67 = arith.constant 56 : index
    %c0_68 = arith.constant 0 : index
    %70 = vector.load %arg2[%c56_67, %c0_68] : memref<80x512xf32, #tpu.memory_space<vmem>>, vector<8x512xf32>
    %c496_i32_69 = arith.constant 496 : i32
    %71 = tpu.dynamic_rotate %44 by %c496_i32_69 dim 1 : vector<8x512xf32>, i32 -> vector<8x512xf32>
    %72 = arith.mulf %71, %70 : vector<8x512xf32>
    %c56_70 = arith.constant 56 : index
    %c0_71 = arith.constant 0 : index
    %73 = vector.load %arg8[%c56_70, %c0_71] : memref<224x512xf32, #tpu.memory_space<vmem>>, vector<8x512xf32>
    tpu.vector_store %arg8[%c56_70, %c0_71], %72 {strides = array<i32>} : memref<224x512xf32, #tpu.memory_space<vmem>>, vector<8x512xf32>,
    %c64_72 = arith.constant 64 : index
    %c0_73 = arith.constant 0 : index
    %74 = vector.load %arg2[%c64_72, %c0_73] : memref<80x512xf32, #tpu.memory_space<vmem>>, vector<8x512xf32>
    %c495_i32_74 = arith.constant 495 : i32
    %75 = tpu.dynamic_rotate %44 by %c495_i32_74 dim 1 : vector<8x512xf32>, i32 -> vector<8x512xf32>
    %76 = arith.mulf %75, %74 : vector<8x512xf32>
    %c64_75 = arith.constant 64 : index
    %c0_76 = arith.constant 0 : index
    %77 = vector.load %arg8[%c64_75, %c0_76] : memref<224x512xf32, #tpu.memory_space<vmem>>, vector<8x512xf32>
    tpu.vector_store %arg8[%c64_75, %c0_76], %76 {strides = array<i32>} : memref<224x512xf32, #tpu.memory_space<vmem>>, vector<8x512xf32>,
    %c72_77 = arith.constant 72 : index
    %c0_78 = arith.constant 0 : index
    %78 = vector.load %arg8[%c72_77, %c0_78] : memref<224x512xf32, #tpu.memory_space<vmem>>, vector<8x512xf32>
    tpu.vector_store %arg8[%c72_77, %c0_78], %0 {strides = array<i32>} : memref<224x512xf32, #tpu.memory_space<vmem>>, vector<8x512xf32>,
    %c0_79 = arith.constant 0 : index
    %c0_80 = arith.constant 0 : index
    %79 = vector.load %arg4[%c0_79, %c0_80] : memref<4x80xf32, #tpu.memory_space<vmem>>, vector<4x80xf32>
    %c0_81 = arith.constant 0 : index
    %c0_82 = arith.constant 0 : index
    %80 = vector.load %arg8[%c0_81, %c0_82] : memref<224x512xf32, #tpu.memory_space<vmem>>, vector<80x512xf32>
    %cst_83 = arith.constant dense<0.000000e+00> : vector<4x512xf32>
    %81 = tpu.matmul %79, %80, %cst_83 {dimension_numbers = #tpu.dot_dimension_numbers<[1], [0], [0], [1], [0, 0, 1, 1], [], []>} : vector<4x80xf32>, vector<80x512xf32>, vector<4x512xf32> -> vector<4x512xf32>
    %82 = arith.negf %81 : vector<4x512xf32>
    %83 = math.exp %82 : vector<4x512xf32>
    %cst_84 = arith.constant 1.000000e+00 : f32
    %84 = vector.broadcast %cst_84 : f32 to vector<4x512xf32>
    %85 = arith.addf %84, %83 : vector<4x512xf32>
    %86 = arith.divf %84, %85 : vector<4x512xf32>
    %87 = arith.mulf %81, %86 : vector<4x512xf32>
    %88 = vector.extract_strided_slice %44 {offsets = [0, 0], sizes = [1, 512], strides = [1, 1]} : vector<8x512xf32> to vector<1x512xf32>
    %c0_85 = arith.constant 0 : index
    %c0_86 = arith.constant 0 : index
    %89 = vector.load %arg9[%c0_85, %c0_86] : memref<8x512xf32, #tpu.memory_space<vmem>>, vector<1x512xf32>
    tpu.vector_store %arg9[%c0_85, %c0_86], %88 {strides = array<i32>} : memref<8x512xf32, #tpu.memory_space<vmem>>, vector<1x512xf32>,
    %90 = vector.extract_strided_slice %87 {offsets = [0, 0], sizes = [1, 512], strides = [1, 1]} : vector<4x512xf32> to vector<1x512xf32>
    %c1 = arith.constant 1 : index
    %c0_87 = arith.constant 0 : index
    %91 = vector.load %arg9[%c1, %c0_87] : memref<8x512xf32, #tpu.memory_space<vmem>>, vector<1x512xf32>
    tpu.vector_store %arg9[%c1, %c0_87], %90 {strides = array<i32>} : memref<8x512xf32, #tpu.memory_space<vmem>>, vector<1x512xf32>,
    %92 = vector.extract_strided_slice %44 {offsets = [1, 0], sizes = [1, 512], strides = [1, 1]} : vector<8x512xf32> to vector<1x512xf32>
    %c2 = arith.constant 2 : index
    %c0_88 = arith.constant 0 : index
    %93 = vector.load %arg9[%c2, %c0_88] : memref<8x512xf32, #tpu.memory_space<vmem>>, vector<1x512xf32>
    tpu.vector_store %arg9[%c2, %c0_88], %92 {strides = array<i32>} : memref<8x512xf32, #tpu.memory_space<vmem>>, vector<1x512xf32>,
    %94 = vector.extract_strided_slice %87 {offsets = [1, 0], sizes = [1, 512], strides = [1, 1]} : vector<4x512xf32> to vector<1x512xf32>
    %c3 = arith.constant 3 : index
    %c0_89 = arith.constant 0 : index
    %95 = vector.load %arg9[%c3, %c0_89] : memref<8x512xf32, #tpu.memory_space<vmem>>, vector<1x512xf32>
    tpu.vector_store %arg9[%c3, %c0_89], %94 {strides = array<i32>} : memref<8x512xf32, #tpu.memory_space<vmem>>, vector<1x512xf32>,
    %96 = vector.extract_strided_slice %44 {offsets = [2, 0], sizes = [1, 512], strides = [1, 1]} : vector<8x512xf32> to vector<1x512xf32>
    %c4 = arith.constant 4 : index
    %c0_90 = arith.constant 0 : index
    %97 = vector.load %arg9[%c4, %c0_90] : memref<8x512xf32, #tpu.memory_space<vmem>>, vector<1x512xf32>
    tpu.vector_store %arg9[%c4, %c0_90], %96 {strides = array<i32>} : memref<8x512xf32, #tpu.memory_space<vmem>>, vector<1x512xf32>,
    %98 = vector.extract_strided_slice %87 {offsets = [2, 0], sizes = [1, 512], strides = [1, 1]} : vector<4x512xf32> to vector<1x512xf32>
    %c5 = arith.constant 5 : index
    %c0_91 = arith.constant 0 : index
    %99 = vector.load %arg9[%c5, %c0_91] : memref<8x512xf32, #tpu.memory_space<vmem>>, vector<1x512xf32>
    tpu.vector_store %arg9[%c5, %c0_91], %98 {strides = array<i32>} : memref<8x512xf32, #tpu.memory_space<vmem>>, vector<1x512xf32>,
    %100 = vector.extract_strided_slice %44 {offsets = [3, 0], sizes = [1, 512], strides = [1, 1]} : vector<8x512xf32> to vector<1x512xf32>
    %c6 = arith.constant 6 : index
    %c0_92 = arith.constant 0 : index
    %101 = vector.load %arg9[%c6, %c0_92] : memref<8x512xf32, #tpu.memory_space<vmem>>, vector<1x512xf32>
    tpu.vector_store %arg9[%c6, %c0_92], %100 {strides = array<i32>} : memref<8x512xf32, #tpu.memory_space<vmem>>, vector<1x512xf32>,
    %102 = vector.extract_strided_slice %87 {offsets = [3, 0], sizes = [1, 512], strides = [1, 1]} : vector<4x512xf32> to vector<1x512xf32>
    %c7 = arith.constant 7 : index
    %c0_93 = arith.constant 0 : index
    %103 = vector.load %arg9[%c7, %c0_93] : memref<8x512xf32, #tpu.memory_space<vmem>>, vector<1x512xf32>
    tpu.vector_store %arg9[%c7, %c0_93], %102 {strides = array<i32>} : memref<8x512xf32, #tpu.memory_space<vmem>>, vector<1x512xf32>,
    %c0_94 = arith.constant 0 : index
    %c0_95 = arith.constant 0 : index
    %104 = vector.load %arg9[%c0_94, %c0_95] : memref<8x512xf32, #tpu.memory_space<vmem>>, vector<8x512xf32>
    %c0_96 = arith.constant 0 : index
    %c0_97 = arith.constant 0 : index
    %105 = vector.load %arg2[%c0_96, %c0_97] : memref<80x512xf32, #tpu.memory_space<vmem>>, vector<8x512xf32>
    %c17_i32_98 = arith.constant 17 : i32
    %106 = tpu.dynamic_rotate %104 by %c17_i32_98 dim 1 : vector<8x512xf32>, i32 -> vector<8x512xf32>
    %107 = arith.mulf %106, %105 : vector<8x512xf32>
    %c0_99 = arith.constant 0 : index
    %c0_100 = arith.constant 0 : index
    %108 = vector.load %arg8[%c0_99, %c0_100] : memref<224x512xf32, #tpu.memory_space<vmem>>, vector<8x512xf32>
    tpu.vector_store %arg8[%c0_99, %c0_100], %107 {strides = array<i32>} : memref<224x512xf32, #tpu.memory_space<vmem>>, vector<8x512xf32>,
    %c8_101 = arith.constant 8 : index
    %c0_102 = arith.constant 0 : index
    %109 = vector.load %arg2[%c8_101, %c0_102] : memref<80x512xf32, #tpu.memory_space<vmem>>, vector<8x512xf32>
    %c16_i32_103 = arith.constant 16 : i32
    %110 = tpu.dynamic_rotate %104 by %c16_i32_103 dim 1 : vector<8x512xf32>, i32 -> vector<8x512xf32>
    %111 = arith.mulf %110, %109 : vector<8x512xf32>
    %c8_104 = arith.constant 8 : index
    %c0_105 = arith.constant 0 : index
    %112 = vector.load %arg8[%c8_104, %c0_105] : memref<224x512xf32, #tpu.memory_space<vmem>>, vector<8x512xf32>
    tpu.vector_store %arg8[%c8_104, %c0_105], %111 {strides = array<i32>} : memref<224x512xf32, #tpu.memory_space<vmem>>, vector<8x512xf32>,
    %c16_106 = arith.constant 16 : index
    %c0_107 = arith.constant 0 : index
    %113 = vector.load %arg2[%c16_106, %c0_107] : memref<80x512xf32, #tpu.memory_space<vmem>>, vector<8x512xf32>
    %c15_i32_108 = arith.constant 15 : i32
    %114 = tpu.dynamic_rotate %104 by %c15_i32_108 dim 1 : vector<8x512xf32>, i32 -> vector<8x512xf32>
    %115 = arith.mulf %114, %113 : vector<8x512xf32>
    %c16_109 = arith.constant 16 : index
    %c0_110 = arith.constant 0 : index
    %116 = vector.load %arg8[%c16_109, %c0_110] : memref<224x512xf32, #tpu.memory_space<vmem>>, vector<8x512xf32>
    tpu.vector_store %arg8[%c16_109, %c0_110], %115 {strides = array<i32>} : memref<224x512xf32, #tpu.memory_space<vmem>>, vector<8x512xf32>,
    %c24_111 = arith.constant 24 : index
    %c0_112 = arith.constant 0 : index
    %117 = vector.load %arg2[%c24_111, %c0_112] : memref<80x512xf32, #tpu.memory_space<vmem>>, vector<8x512xf32>
    %c1_i32_113 = arith.constant 1 : i32
    %118 = tpu.dynamic_rotate %104 by %c1_i32_113 dim 1 : vector<8x512xf32>, i32 -> vector<8x512xf32>
    %119 = arith.mulf %118, %117 : vector<8x512xf32>
    %c24_114 = arith.constant 24 : index
    %c0_115 = arith.constant 0 : index
    %120 = vector.load %arg8[%c24_114, %c0_115] : memref<224x512xf32, #tpu.memory_space<vmem>>, vector<8x512xf32>
    tpu.vector_store %arg8[%c24_114, %c0_115], %119 {strides = array<i32>} : memref<224x512xf32, #tpu.memory_space<vmem>>, vector<8x512xf32>,
    %c32_116 = arith.constant 32 : index
    %c0_117 = arith.constant 0 : index
    %121 = vector.load %arg8[%c32_116, %c0_117] : memref<224x512xf32, #tpu.memory_space<vmem>>, vector<8x512xf32>
    tpu.vector_store %arg8[%c32_116, %c0_117], %104 {strides = array<i32>} : memref<224x512xf32, #tpu.memory_space<vmem>>, vector<8x512xf32>,
    %c40_118 = arith.constant 40 : index
    %c0_119 = arith.constant 0 : index
    %122 = vector.load %arg2[%c40_118, %c0_119] : memref<80x512xf32, #tpu.memory_space<vmem>>, vector<8x512xf32>
    %c511_i32_120 = arith.constant 511 : i32
    %123 = tpu.dynamic_rotate %104 by %c511_i32_120 dim 1 : vector<8x512xf32>, i32 -> vector<8x512xf32>
    %124 = arith.mulf %123, %122 : vector<8x512xf32>
    %c40_121 = arith.constant 40 : index
    %c0_122 = arith.constant 0 : index
    %125 = vector.load %arg8[%c40_121, %c0_122] : memref<224x512xf32, #tpu.memory_space<vmem>>, vector<8x512xf32>
    tpu.vector_store %arg8[%c40_121, %c0_122], %124 {strides = array<i32>} : memref<224x512xf32, #tpu.memory_space<vmem>>, vector<8x512xf32>,
    %c48_123 = arith.constant 48 : index
    %c0_124 = arith.constant 0 : index
    %126 = vector.load %arg2[%c48_123, %c0_124] : memref<80x512xf32, #tpu.memory_space<vmem>>, vector<8x512xf32>
    %c497_i32_125 = arith.constant 497 : i32
    %127 = tpu.dynamic_rotate %104 by %c497_i32_125 dim 1 : vector<8x512xf32>, i32 -> vector<8x512xf32>
    %128 = arith.mulf %127, %126 : vector<8x512xf32>
    %c48_126 = arith.constant 48 : index
    %c0_127 = arith.constant 0 : index
    %129 = vector.load %arg8[%c48_126, %c0_127] : memref<224x512xf32, #tpu.memory_space<vmem>>, vector<8x512xf32>
    tpu.vector_store %arg8[%c48_126, %c0_127], %128 {strides = array<i32>} : memref<224x512xf32, #tpu.memory_space<vmem>>, vector<8x512xf32>,
    %c56_128 = arith.constant 56 : index
    %c0_129 = arith.constant 0 : index
    %130 = vector.load %arg2[%c56_128, %c0_129] : memref<80x512xf32, #tpu.memory_space<vmem>>, vector<8x512xf32>
    %c496_i32_130 = arith.constant 496 : i32
    %131 = tpu.dynamic_rotate %104 by %c496_i32_130 dim 1 : vector<8x512xf32>, i32 -> vector<8x512xf32>
    %132 = arith.mulf %131, %130 : vector<8x512xf32>
    %c56_131 = arith.constant 56 : index
    %c0_132 = arith.constant 0 : index
    %133 = vector.load %arg8[%c56_131, %c0_132] : memref<224x512xf32, #tpu.memory_space<vmem>>, vector<8x512xf32>
    tpu.vector_store %arg8[%c56_131, %c0_132], %132 {strides = array<i32>} : memref<224x512xf32, #tpu.memory_space<vmem>>, vector<8x512xf32>,
    %c64_133 = arith.constant 64 : index
    %c0_134 = arith.constant 0 : index
    %134 = vector.load %arg2[%c64_133, %c0_134] : memref<80x512xf32, #tpu.memory_space<vmem>>, vector<8x512xf32>
    %c495_i32_135 = arith.constant 495 : i32
    %135 = tpu.dynamic_rotate %104 by %c495_i32_135 dim 1 : vector<8x512xf32>, i32 -> vector<8x512xf32>
    %136 = arith.mulf %135, %134 : vector<8x512xf32>
    %c64_136 = arith.constant 64 : index
    %c0_137 = arith.constant 0 : index
    %137 = vector.load %arg8[%c64_136, %c0_137] : memref<224x512xf32, #tpu.memory_space<vmem>>, vector<8x512xf32>
    tpu.vector_store %arg8[%c64_136, %c0_137], %136 {strides = array<i32>} : memref<224x512xf32, #tpu.memory_space<vmem>>, vector<8x512xf32>,
    %c72_138 = arith.constant 72 : index
    %c0_139 = arith.constant 0 : index
    %138 = vector.load %arg8[%c72_138, %c0_139] : memref<224x512xf32, #tpu.memory_space<vmem>>, vector<8x512xf32>
    tpu.vector_store %arg8[%c72_138, %c0_139], %0 {strides = array<i32>} : memref<224x512xf32, #tpu.memory_space<vmem>>, vector<8x512xf32>,
    %c0_140 = arith.constant 0 : index
    %c0_141 = arith.constant 0 : index
    %139 = vector.load %arg5[%c0_140, %c0_141] : memref<4x80xf32, #tpu.memory_space<vmem>>, vector<4x80xf32>
    %c0_142 = arith.constant 0 : index
    %c0_143 = arith.constant 0 : index
    %140 = vector.load %arg8[%c0_142, %c0_143] : memref<224x512xf32, #tpu.memory_space<vmem>>, vector<80x512xf32>
    %cst_144 = arith.constant dense<0.000000e+00> : vector<4x512xf32>
    %141 = tpu.matmul %139, %140, %cst_144 {dimension_numbers = #tpu.dot_dimension_numbers<[1], [0], [0], [1], [0, 0, 1, 1], [], []>} : vector<4x80xf32>, vector<80x512xf32>, vector<4x512xf32> -> vector<4x512xf32>
    %142 = arith.negf %141 : vector<4x512xf32>
    %143 = math.exp %142 : vector<4x512xf32>
    %cst_145 = arith.constant 1.000000e+00 : f32
    %144 = vector.broadcast %cst_145 : f32 to vector<4x512xf32>
    %145 = arith.addf %144, %143 : vector<4x512xf32>
    %146 = arith.divf %144, %145 : vector<4x512xf32>
    %147 = arith.mulf %141, %146 : vector<4x512xf32>
    %148 = vector.extract_strided_slice %104 {offsets = [0, 0], sizes = [1, 512], strides = [1, 1]} : vector<8x512xf32> to vector<1x512xf32>
    %c0_146 = arith.constant 0 : index
    %c0_147 = arith.constant 0 : index
    %149 = vector.load %arg9[%c0_146, %c0_147] : memref<8x512xf32, #tpu.memory_space<vmem>>, vector<1x512xf32>
    tpu.vector_store %arg9[%c0_146, %c0_147], %148 {strides = array<i32>} : memref<8x512xf32, #tpu.memory_space<vmem>>, vector<1x512xf32>,
    %150 = vector.extract_strided_slice %147 {offsets = [0, 0], sizes = [1, 512], strides = [1, 1]} : vector<4x512xf32> to vector<1x512xf32>
    %c1_148 = arith.constant 1 : index
    %c0_149 = arith.constant 0 : index
    %151 = vector.load %arg9[%c1_148, %c0_149] : memref<8x512xf32, #tpu.memory_space<vmem>>, vector<1x512xf32>
    tpu.vector_store %arg9[%c1_148, %c0_149], %150 {strides = array<i32>} : memref<8x512xf32, #tpu.memory_space<vmem>>, vector<1x512xf32>,
    %152 = vector.extract_strided_slice %104 {offsets = [1, 0], sizes = [1, 512], strides = [1, 1]} : vector<8x512xf32> to vector<1x512xf32>
    %c2_150 = arith.constant 2 : index
    %c0_151 = arith.constant 0 : index
    %153 = vector.load %arg9[%c2_150, %c0_151] : memref<8x512xf32, #tpu.memory_space<vmem>>, vector<1x512xf32>
    tpu.vector_store %arg9[%c2_150, %c0_151], %152 {strides = array<i32>} : memref<8x512xf32, #tpu.memory_space<vmem>>, vector<1x512xf32>,
    %154 = vector.extract_strided_slice %147 {offsets = [1, 0], sizes = [1, 512], strides = [1, 1]} : vector<4x512xf32> to vector<1x512xf32>
    %c3_152 = arith.constant 3 : index
    %c0_153 = arith.constant 0 : index
    %155 = vector.load %arg9[%c3_152, %c0_153] : memref<8x512xf32, #tpu.memory_space<vmem>>, vector<1x512xf32>
    tpu.vector_store %arg9[%c3_152, %c0_153], %154 {strides = array<i32>} : memref<8x512xf32, #tpu.memory_space<vmem>>, vector<1x512xf32>,
    %156 = vector.extract_strided_slice %104 {offsets = [2, 0], sizes = [1, 512], strides = [1, 1]} : vector<8x512xf32> to vector<1x512xf32>
    %c4_154 = arith.constant 4 : index
    %c0_155 = arith.constant 0 : index
    %157 = vector.load %arg9[%c4_154, %c0_155] : memref<8x512xf32, #tpu.memory_space<vmem>>, vector<1x512xf32>
    tpu.vector_store %arg9[%c4_154, %c0_155], %156 {strides = array<i32>} : memref<8x512xf32, #tpu.memory_space<vmem>>, vector<1x512xf32>,
    %158 = vector.extract_strided_slice %147 {offsets = [2, 0], sizes = [1, 512], strides = [1, 1]} : vector<4x512xf32> to vector<1x512xf32>
    %c5_156 = arith.constant 5 : index
    %c0_157 = arith.constant 0 : index
    %159 = vector.load %arg9[%c5_156, %c0_157] : memref<8x512xf32, #tpu.memory_space<vmem>>, vector<1x512xf32>
    tpu.vector_store %arg9[%c5_156, %c0_157], %158 {strides = array<i32>} : memref<8x512xf32, #tpu.memory_space<vmem>>, vector<1x512xf32>,
    %160 = vector.extract_strided_slice %104 {offsets = [3, 0], sizes = [1, 512], strides = [1, 1]} : vector<8x512xf32> to vector<1x512xf32>
    %c6_158 = arith.constant 6 : index
    %c0_159 = arith.constant 0 : index
    %161 = vector.load %arg9[%c6_158, %c0_159] : memref<8x512xf32, #tpu.memory_space<vmem>>, vector<1x512xf32>
    tpu.vector_store %arg9[%c6_158, %c0_159], %160 {strides = array<i32>} : memref<8x512xf32, #tpu.memory_space<vmem>>, vector<1x512xf32>,
    %162 = vector.extract_strided_slice %147 {offsets = [3, 0], sizes = [1, 512], strides = [1, 1]} : vector<4x512xf32> to vector<1x512xf32>
    %c7_160 = arith.constant 7 : index
    %c0_161 = arith.constant 0 : index
    %163 = vector.load %arg9[%c7_160, %c0_161] : memref<8x512xf32, #tpu.memory_space<vmem>>, vector<1x512xf32>
    tpu.vector_store %arg9[%c7_160, %c0_161], %162 {strides = array<i32>} : memref<8x512xf32, #tpu.memory_space<vmem>>, vector<1x512xf32>,
    %c0_162 = arith.constant 0 : index
    %c0_163 = arith.constant 0 : index
    %164 = vector.load %arg9[%c0_162, %c0_163] : memref<8x512xf32, #tpu.memory_space<vmem>>, vector<8x512xf32>
    %c0_164 = arith.constant 0 : index
    %c0_165 = arith.constant 0 : index
    %165 = vector.load %arg2[%c0_164, %c0_165] : memref<80x512xf32, #tpu.memory_space<vmem>>, vector<8x512xf32>
    %c17_i32_166 = arith.constant 17 : i32
    %166 = tpu.dynamic_rotate %44 by %c17_i32_166 dim 1 : vector<8x512xf32>, i32 -> vector<8x512xf32>
    %167 = arith.mulf %166, %165 : vector<8x512xf32>
    %c0_167 = arith.constant 0 : index
    %c0_168 = arith.constant 0 : index
    %168 = vector.load %arg8[%c0_167, %c0_168] : memref<224x512xf32, #tpu.memory_space<vmem>>, vector<8x512xf32>
    tpu.vector_store %arg8[%c0_167, %c0_168], %167 {strides = array<i32>} : memref<224x512xf32, #tpu.memory_space<vmem>>, vector<8x512xf32>,
    %c17_i32_169 = arith.constant 17 : i32
    %169 = tpu.dynamic_rotate %104 by %c17_i32_169 dim 1 : vector<8x512xf32>, i32 -> vector<8x512xf32>
    %170 = arith.mulf %169, %165 : vector<8x512xf32>
    %c8_170 = arith.constant 8 : index
    %c0_171 = arith.constant 0 : index
    %171 = vector.load %arg8[%c8_170, %c0_171] : memref<224x512xf32, #tpu.memory_space<vmem>>, vector<8x512xf32>
    tpu.vector_store %arg8[%c8_170, %c0_171], %170 {strides = array<i32>} : memref<224x512xf32, #tpu.memory_space<vmem>>, vector<8x512xf32>,
    %c17_i32_172 = arith.constant 17 : i32
    %172 = tpu.dynamic_rotate %164 by %c17_i32_172 dim 1 : vector<8x512xf32>, i32 -> vector<8x512xf32>
    %173 = arith.mulf %172, %165 : vector<8x512xf32>
    %c16_173 = arith.constant 16 : index
    %c0_174 = arith.constant 0 : index
    %174 = vector.load %arg8[%c16_173, %c0_174] : memref<224x512xf32, #tpu.memory_space<vmem>>, vector<8x512xf32>
    tpu.vector_store %arg8[%c16_173, %c0_174], %173 {strides = array<i32>} : memref<224x512xf32, #tpu.memory_space<vmem>>, vector<8x512xf32>,
    %c8_175 = arith.constant 8 : index
    %c0_176 = arith.constant 0 : index
    %175 = vector.load %arg2[%c8_175, %c0_176] : memref<80x512xf32, #tpu.memory_space<vmem>>, vector<8x512xf32>
    %c16_i32_177 = arith.constant 16 : i32
    %176 = tpu.dynamic_rotate %44 by %c16_i32_177 dim 1 : vector<8x512xf32>, i32 -> vector<8x512xf32>
    %177 = arith.mulf %176, %175 : vector<8x512xf32>
    %c24_178 = arith.constant 24 : index
    %c0_179 = arith.constant 0 : index
    %178 = vector.load %arg8[%c24_178, %c0_179] : memref<224x512xf32, #tpu.memory_space<vmem>>, vector<8x512xf32>
    tpu.vector_store %arg8[%c24_178, %c0_179], %177 {strides = array<i32>} : memref<224x512xf32, #tpu.memory_space<vmem>>, vector<8x512xf32>,
    %c16_i32_180 = arith.constant 16 : i32
    %179 = tpu.dynamic_rotate %104 by %c16_i32_180 dim 1 : vector<8x512xf32>, i32 -> vector<8x512xf32>
    %180 = arith.mulf %179, %175 : vector<8x512xf32>
    %c32_181 = arith.constant 32 : index
    %c0_182 = arith.constant 0 : index
    %181 = vector.load %arg8[%c32_181, %c0_182] : memref<224x512xf32, #tpu.memory_space<vmem>>, vector<8x512xf32>
    tpu.vector_store %arg8[%c32_181, %c0_182], %180 {strides = array<i32>} : memref<224x512xf32, #tpu.memory_space<vmem>>, vector<8x512xf32>,
    %c16_i32_183 = arith.constant 16 : i32
    %182 = tpu.dynamic_rotate %164 by %c16_i32_183 dim 1 : vector<8x512xf32>, i32 -> vector<8x512xf32>
    %183 = arith.mulf %182, %175 : vector<8x512xf32>
    %c40_184 = arith.constant 40 : index
    %c0_185 = arith.constant 0 : index
    %184 = vector.load %arg8[%c40_184, %c0_185] : memref<224x512xf32, #tpu.memory_space<vmem>>, vector<8x512xf32>
    tpu.vector_store %arg8[%c40_184, %c0_185], %183 {strides = array<i32>} : memref<224x512xf32, #tpu.memory_space<vmem>>, vector<8x512xf32>,
    %c16_186 = arith.constant 16 : index
    %c0_187 = arith.constant 0 : index
    %185 = vector.load %arg2[%c16_186, %c0_187] : memref<80x512xf32, #tpu.memory_space<vmem>>, vector<8x512xf32>
    %c15_i32_188 = arith.constant 15 : i32
    %186 = tpu.dynamic_rotate %44 by %c15_i32_188 dim 1 : vector<8x512xf32>, i32 -> vector<8x512xf32>
    %187 = arith.mulf %186, %185 : vector<8x512xf32>
    %c48_189 = arith.constant 48 : index
    %c0_190 = arith.constant 0 : index
    %188 = vector.load %arg8[%c48_189, %c0_190] : memref<224x512xf32, #tpu.memory_space<vmem>>, vector<8x512xf32>
    tpu.vector_store %arg8[%c48_189, %c0_190], %187 {strides = array<i32>} : memref<224x512xf32, #tpu.memory_space<vmem>>, vector<8x512xf32>,
    %c15_i32_191 = arith.constant 15 : i32
    %189 = tpu.dynamic_rotate %104 by %c15_i32_191 dim 1 : vector<8x512xf32>, i32 -> vector<8x512xf32>
    %190 = arith.mulf %189, %185 : vector<8x512xf32>
    %c56_192 = arith.constant 56 : index
    %c0_193 = arith.constant 0 : index
    %191 = vector.load %arg8[%c56_192, %c0_193] : memref<224x512xf32, #tpu.memory_space<vmem>>, vector<8x512xf32>
    tpu.vector_store %arg8[%c56_192, %c0_193], %190 {strides = array<i32>} : memref<224x512xf32, #tpu.memory_space<vmem>>, vector<8x512xf32>,
    %c15_i32_194 = arith.constant 15 : i32
    %192 = tpu.dynamic_rotate %164 by %c15_i32_194 dim 1 : vector<8x512xf32>, i32 -> vector<8x512xf32>
    %193 = arith.mulf %192, %185 : vector<8x512xf32>
    %c64_195 = arith.constant 64 : index
    %c0_196 = arith.constant 0 : index
    %194 = vector.load %arg8[%c64_195, %c0_196] : memref<224x512xf32, #tpu.memory_space<vmem>>, vector<8x512xf32>
    tpu.vector_store %arg8[%c64_195, %c0_196], %193 {strides = array<i32>} : memref<224x512xf32, #tpu.memory_space<vmem>>, vector<8x512xf32>,
    %c24_197 = arith.constant 24 : index
    %c0_198 = arith.constant 0 : index
    %195 = vector.load %arg2[%c24_197, %c0_198] : memref<80x512xf32, #tpu.memory_space<vmem>>, vector<8x512xf32>
    %c1_i32_199 = arith.constant 1 : i32
    %196 = tpu.dynamic_rotate %44 by %c1_i32_199 dim 1 : vector<8x512xf32>, i32 -> vector<8x512xf32>
    %197 = arith.mulf %196, %195 : vector<8x512xf32>
    %c72_200 = arith.constant 72 : index
    %c0_201 = arith.constant 0 : index
    %198 = vector.load %arg8[%c72_200, %c0_201] : memref<224x512xf32, #tpu.memory_space<vmem>>, vector<8x512xf32>
    tpu.vector_store %arg8[%c72_200, %c0_201], %197 {strides = array<i32>} : memref<224x512xf32, #tpu.memory_space<vmem>>, vector<8x512xf32>,
    %c1_i32_202 = arith.constant 1 : i32
    %199 = tpu.dynamic_rotate %104 by %c1_i32_202 dim 1 : vector<8x512xf32>, i32 -> vector<8x512xf32>
    %200 = arith.mulf %199, %195 : vector<8x512xf32>
    %c80 = arith.constant 80 : index
    %c0_203 = arith.constant 0 : index
    %201 = vector.load %arg8[%c80, %c0_203] : memref<224x512xf32, #tpu.memory_space<vmem>>, vector<8x512xf32>
    tpu.vector_store %arg8[%c80, %c0_203], %200 {strides = array<i32>} : memref<224x512xf32, #tpu.memory_space<vmem>>, vector<8x512xf32>,
    %c1_i32_204 = arith.constant 1 : i32
    %202 = tpu.dynamic_rotate %164 by %c1_i32_204 dim 1 : vector<8x512xf32>, i32 -> vector<8x512xf32>
    %203 = arith.mulf %202, %195 : vector<8x512xf32>
    %c88 = arith.constant 88 : index
    %c0_205 = arith.constant 0 : index
    %204 = vector.load %arg8[%c88, %c0_205] : memref<224x512xf32, #tpu.memory_space<vmem>>, vector<8x512xf32>
    tpu.vector_store %arg8[%c88, %c0_205], %203 {strides = array<i32>} : memref<224x512xf32, #tpu.memory_space<vmem>>, vector<8x512xf32>,
    %c96 = arith.constant 96 : index
    %c0_206 = arith.constant 0 : index
    %205 = vector.load %arg8[%c96, %c0_206] : memref<224x512xf32, #tpu.memory_space<vmem>>, vector<8x512xf32>
    tpu.vector_store %arg8[%c96, %c0_206], %44 {strides = array<i32>} : memref<224x512xf32, #tpu.memory_space<vmem>>, vector<8x512xf32>,
    %c104 = arith.constant 104 : index
    %c0_207 = arith.constant 0 : index
    %206 = vector.load %arg8[%c104, %c0_207] : memref<224x512xf32, #tpu.memory_space<vmem>>, vector<8x512xf32>
    tpu.vector_store %arg8[%c104, %c0_207], %104 {strides = array<i32>} : memref<224x512xf32, #tpu.memory_space<vmem>>, vector<8x512xf32>,
    %c112 = arith.constant 112 : index
    %c0_208 = arith.constant 0 : index
    %207 = vector.load %arg8[%c112, %c0_208] : memref<224x512xf32, #tpu.memory_space<vmem>>, vector<8x512xf32>
    tpu.vector_store %arg8[%c112, %c0_208], %164 {strides = array<i32>} : memref<224x512xf32, #tpu.memory_space<vmem>>, vector<8x512xf32>,
    %c40_209 = arith.constant 40 : index
    %c0_210 = arith.constant 0 : index
    %208 = vector.load %arg2[%c40_209, %c0_210] : memref<80x512xf32, #tpu.memory_space<vmem>>, vector<8x512xf32>
    %c511_i32_211 = arith.constant 511 : i32
    %209 = tpu.dynamic_rotate %44 by %c511_i32_211 dim 1 : vector<8x512xf32>, i32 -> vector<8x512xf32>
    %210 = arith.mulf %209, %208 : vector<8x512xf32>
    %c120 = arith.constant 120 : index
    %c0_212 = arith.constant 0 : index
    %211 = vector.load %arg8[%c120, %c0_212] : memref<224x512xf32, #tpu.memory_space<vmem>>, vector<8x512xf32>
    tpu.vector_store %arg8[%c120, %c0_212], %210 {strides = array<i32>} : memref<224x512xf32, #tpu.memory_space<vmem>>, vector<8x512xf32>,
    %c511_i32_213 = arith.constant 511 : i32
    %212 = tpu.dynamic_rotate %104 by %c511_i32_213 dim 1 : vector<8x512xf32>, i32 -> vector<8x512xf32>
    %213 = arith.mulf %212, %208 : vector<8x512xf32>
    %c128 = arith.constant 128 : index
    %c0_214 = arith.constant 0 : index
    %214 = vector.load %arg8[%c128, %c0_214] : memref<224x512xf32, #tpu.memory_space<vmem>>, vector<8x512xf32>
    tpu.vector_store %arg8[%c128, %c0_214], %213 {strides = array<i32>} : memref<224x512xf32, #tpu.memory_space<vmem>>, vector<8x512xf32>,
    %c511_i32_215 = arith.constant 511 : i32
    %215 = tpu.dynamic_rotate %164 by %c511_i32_215 dim 1 : vector<8x512xf32>, i32 -> vector<8x512xf32>
    %216 = arith.mulf %215, %208 : vector<8x512xf32>
    %c136 = arith.constant 136 : index
    %c0_216 = arith.constant 0 : index
    %217 = vector.load %arg8[%c136, %c0_216] : memref<224x512xf32, #tpu.memory_space<vmem>>, vector<8x512xf32>
    tpu.vector_store %arg8[%c136, %c0_216], %216 {strides = array<i32>} : memref<224x512xf32, #tpu.memory_space<vmem>>, vector<8x512xf32>,
    %c48_217 = arith.constant 48 : index
    %c0_218 = arith.constant 0 : index
    %218 = vector.load %arg2[%c48_217, %c0_218] : memref<80x512xf32, #tpu.memory_space<vmem>>, vector<8x512xf32>
    %c497_i32_219 = arith.constant 497 : i32
    %219 = tpu.dynamic_rotate %44 by %c497_i32_219 dim 1 : vector<8x512xf32>, i32 -> vector<8x512xf32>
    %220 = arith.mulf %219, %218 : vector<8x512xf32>
    %c144 = arith.constant 144 : index
    %c0_220 = arith.constant 0 : index
    %221 = vector.load %arg8[%c144, %c0_220] : memref<224x512xf32, #tpu.memory_space<vmem>>, vector<8x512xf32>
    tpu.vector_store %arg8[%c144, %c0_220], %220 {strides = array<i32>} : memref<224x512xf32, #tpu.memory_space<vmem>>, vector<8x512xf32>,
    %c497_i32_221 = arith.constant 497 : i32
    %222 = tpu.dynamic_rotate %104 by %c497_i32_221 dim 1 : vector<8x512xf32>, i32 -> vector<8x512xf32>
    %223 = arith.mulf %222, %218 : vector<8x512xf32>
    %c152 = arith.constant 152 : index
    %c0_222 = arith.constant 0 : index
    %224 = vector.load %arg8[%c152, %c0_222] : memref<224x512xf32, #tpu.memory_space<vmem>>, vector<8x512xf32>
    tpu.vector_store %arg8[%c152, %c0_222], %223 {strides = array<i32>} : memref<224x512xf32, #tpu.memory_space<vmem>>, vector<8x512xf32>,
    %c497_i32_223 = arith.constant 497 : i32
    %225 = tpu.dynamic_rotate %164 by %c497_i32_223 dim 1 : vector<8x512xf32>, i32 -> vector<8x512xf32>
    %226 = arith.mulf %225, %218 : vector<8x512xf32>
    %c160 = arith.constant 160 : index
    %c0_224 = arith.constant 0 : index
    %227 = vector.load %arg8[%c160, %c0_224] : memref<224x512xf32, #tpu.memory_space<vmem>>, vector<8x512xf32>
    tpu.vector_store %arg8[%c160, %c0_224], %226 {strides = array<i32>} : memref<224x512xf32, #tpu.memory_space<vmem>>, vector<8x512xf32>,
    %c56_225 = arith.constant 56 : index
    %c0_226 = arith.constant 0 : index
    %228 = vector.load %arg2[%c56_225, %c0_226] : memref<80x512xf32, #tpu.memory_space<vmem>>, vector<8x512xf32>
    %c496_i32_227 = arith.constant 496 : i32
    %229 = tpu.dynamic_rotate %44 by %c496_i32_227 dim 1 : vector<8x512xf32>, i32 -> vector<8x512xf32>
    %230 = arith.mulf %229, %228 : vector<8x512xf32>
    %c168 = arith.constant 168 : index
    %c0_228 = arith.constant 0 : index
    %231 = vector.load %arg8[%c168, %c0_228] : memref<224x512xf32, #tpu.memory_space<vmem>>, vector<8x512xf32>
    tpu.vector_store %arg8[%c168, %c0_228], %230 {strides = array<i32>} : memref<224x512xf32, #tpu.memory_space<vmem>>, vector<8x512xf32>,
    %c496_i32_229 = arith.constant 496 : i32
    %232 = tpu.dynamic_rotate %104 by %c496_i32_229 dim 1 : vector<8x512xf32>, i32 -> vector<8x512xf32>
    %233 = arith.mulf %232, %228 : vector<8x512xf32>
    %c176 = arith.constant 176 : index
    %c0_230 = arith.constant 0 : index
    %234 = vector.load %arg8[%c176, %c0_230] : memref<224x512xf32, #tpu.memory_space<vmem>>, vector<8x512xf32>
    tpu.vector_store %arg8[%c176, %c0_230], %233 {strides = array<i32>} : memref<224x512xf32, #tpu.memory_space<vmem>>, vector<8x512xf32>,
    %c496_i32_231 = arith.constant 496 : i32
    %235 = tpu.dynamic_rotate %164 by %c496_i32_231 dim 1 : vector<8x512xf32>, i32 -> vector<8x512xf32>
    %236 = arith.mulf %235, %228 : vector<8x512xf32>
    %c184 = arith.constant 184 : index
    %c0_232 = arith.constant 0 : index
    %237 = vector.load %arg8[%c184, %c0_232] : memref<224x512xf32, #tpu.memory_space<vmem>>, vector<8x512xf32>
    tpu.vector_store %arg8[%c184, %c0_232], %236 {strides = array<i32>} : memref<224x512xf32, #tpu.memory_space<vmem>>, vector<8x512xf32>,
    %c64_233 = arith.constant 64 : index
    %c0_234 = arith.constant 0 : index
    %238 = vector.load %arg2[%c64_233, %c0_234] : memref<80x512xf32, #tpu.memory_space<vmem>>, vector<8x512xf32>
    %c495_i32_235 = arith.constant 495 : i32
    %239 = tpu.dynamic_rotate %44 by %c495_i32_235 dim 1 : vector<8x512xf32>, i32 -> vector<8x512xf32>
    %240 = arith.mulf %239, %238 : vector<8x512xf32>
    %c192 = arith.constant 192 : index
    %c0_236 = arith.constant 0 : index
    %241 = vector.load %arg8[%c192, %c0_236] : memref<224x512xf32, #tpu.memory_space<vmem>>, vector<8x512xf32>
    tpu.vector_store %arg8[%c192, %c0_236], %240 {strides = array<i32>} : memref<224x512xf32, #tpu.memory_space<vmem>>, vector<8x512xf32>,
    %c495_i32_237 = arith.constant 495 : i32
    %242 = tpu.dynamic_rotate %104 by %c495_i32_237 dim 1 : vector<8x512xf32>, i32 -> vector<8x512xf32>
    %243 = arith.mulf %242, %238 : vector<8x512xf32>
    %c200 = arith.constant 200 : index
    %c0_238 = arith.constant 0 : index
    %244 = vector.load %arg8[%c200, %c0_238] : memref<224x512xf32, #tpu.memory_space<vmem>>, vector<8x512xf32>
    tpu.vector_store %arg8[%c200, %c0_238], %243 {strides = array<i32>} : memref<224x512xf32, #tpu.memory_space<vmem>>, vector<8x512xf32>,
    %c495_i32_239 = arith.constant 495 : i32
    %245 = tpu.dynamic_rotate %164 by %c495_i32_239 dim 1 : vector<8x512xf32>, i32 -> vector<8x512xf32>
    %246 = arith.mulf %245, %238 : vector<8x512xf32>
    %c208 = arith.constant 208 : index
    %c0_240 = arith.constant 0 : index
    %247 = vector.load %arg8[%c208, %c0_240] : memref<224x512xf32, #tpu.memory_space<vmem>>, vector<8x512xf32>
    tpu.vector_store %arg8[%c208, %c0_240], %246 {strides = array<i32>} : memref<224x512xf32, #tpu.memory_space<vmem>>, vector<8x512xf32>,
    %c216 = arith.constant 216 : index
    %c0_241 = arith.constant 0 : index
    %248 = vector.load %arg8[%c216, %c0_241] : memref<224x512xf32, #tpu.memory_space<vmem>>, vector<8x512xf32>
    tpu.vector_store %arg8[%c216, %c0_241], %0 {strides = array<i32>} : memref<224x512xf32, #tpu.memory_space<vmem>>, vector<8x512xf32>,
    %c0_242 = arith.constant 0 : index
    %c0_243 = arith.constant 0 : index
    %249 = vector.load %arg6[%c0_242, %c0_243] : memref<8x224xf32, #tpu.memory_space<vmem>>, vector<8x224xf32>
    %c0_244 = arith.constant 0 : index
    %c0_245 = arith.constant 0 : index
    %250 = vector.load %arg8[%c0_244, %c0_245] : memref<224x512xf32, #tpu.memory_space<vmem>>, vector<224x512xf32>
    %cst_246 = arith.constant dense<0.000000e+00> : vector<8x512xf32>
    %251 = tpu.matmul %249, %250, %cst_246 {dimension_numbers = #tpu.dot_dimension_numbers<[1], [0], [0], [1], [0, 0, 1, 1], [], []>} : vector<8x224xf32>, vector<224x512xf32>, vector<8x512xf32> -> vector<8x512xf32>
    %252 = arith.negf %251 : vector<8x512xf32>
    %253 = math.exp %252 : vector<8x512xf32>
    %cst_247 = arith.constant 1.000000e+00 : f32
    %254 = vector.broadcast %cst_247 : f32 to vector<8x512xf32>
    %255 = arith.addf %254, %253 : vector<8x512xf32>
    %256 = arith.divf %254, %255 : vector<8x512xf32>
    %257 = arith.mulf %251, %256 : vector<8x512xf32>
    %c0_248 = arith.constant 0 : index
    %c0_249 = arith.constant 0 : index
    %258 = vector.load %arg7[%c0_248, %c0_249] : memref<8x512xf32, #tpu.memory_space<vmem>>, vector<8x512xf32>
    tpu.vector_store %arg7[%c0_248, %c0_249], %257 {strides = array<i32>} : memref<8x512xf32, #tpu.memory_space<vmem>>, vector<8x512xf32>,
    return
  }
  func.func @transform_0(%arg0: i32) -> (i32, i32) {
    %c0_i32 = arith.constant 0 : i32
    %c0_i32_0 = arith.constant 0 : i32
    return %c0_i32, %arg0 : i32, i32
  }
  func.func @transform_1(%arg0: i32) -> (i32, i32) {
    %c0_i32 = arith.constant 0 : i32
    %c0_i32_0 = arith.constant 0 : i32
    %c0_i32_1 = arith.constant 0 : i32
    return %c0_i32, %c0_i32_0 : i32, i32
  }
  func.func @transform_2(%arg0: i32) -> (i32, i32) {
    %c0_i32 = arith.constant 0 : i32
    %c0_i32_0 = arith.constant 0 : i32
    %c0_i32_1 = arith.constant 0 : i32
    return %c0_i32, %c0_i32_0 : i32, i32
  }
  func.func @transform_3(%arg0: i32) -> (i32, i32) {
    %c0_i32 = arith.constant 0 : i32
    %c0_i32_0 = arith.constant 0 : i32
    %c0_i32_1 = arith.constant 0 : i32
    return %c0_i32, %c0_i32_0 : i32, i32
  }
  func.func @transform_4(%arg0: i32) -> (i32, i32) {
    %c0_i32 = arith.constant 0 : i32
    %c0_i32_0 = arith.constant 0 : i32
    %c0_i32_1 = arith.constant 0 : i32
    return %c0_i32, %c0_i32_0 : i32, i32
  }
  func.func @transform_5(%arg0: i32) -> (i32, i32) {
    %c0_i32 = arith.constant 0 : i32
    %c0_i32_0 = arith.constant 0 : i32
    %c0_i32_1 = arith.constant 0 : i32
    return %c0_i32, %c0_i32_0 : i32, i32
  }
  func.func @transform_6(%arg0: i32) -> (i32, i32) {
    %c0_i32 = arith.constant 0 : i32
    %c0_i32_0 = arith.constant 0 : i32
    return %c0_i32, %arg0 : i32, i32
  }
}

</mosaic_0001>

<bundles_post_ra>
// kernel: _lambda_.1
= control target key start
LH: loop header
LB: loop body
LE: loop exit
PB: predicated region body
PF: predicated region fallthrough
CT: control target
= control target key end

     0   :  { %s2501_s25 = smov 17   ;;  %s2502_s30 = smov 16   ;;  %v4124_v4 = vmov 0.0   ;;  %v43_v5 = vlaneseq  ;;  %vm282_vm8 = vcmask 654336   ;;  %vm1953_vm10 = vcmask 785408   ;;  %s4117_s0 = inlined_call_operand.vmem [shape: f32[8,512], index: 0, kind: input, shape index: {}]   ;;  %s4118_s1 = inlined_call_operand.vmem [shape: f32[80,512], index: 1, kind: input, shape index: {}]   ;;  %s4119_s2 = inlined_call_operand.vmem [shape: f32[8,80], index: 2, kind: input, shape index: {}]   ;;  %s4120_s3 = inlined_call_operand.vmem [shape: f32[4,80], index: 3, kind: input, shape index: {}]   ;;  %s4121_s4 = inlined_call_operand.vmem [shape: f32[4,80], index: 4, kind: input, shape index: {}]   ;;  %s4122_s5 = inlined_call_operand.vmem [shape: f32[8,224], index: 5, kind: input, shape index: {}]   ;;  %s4123_s6 = inlined_call_operand.vmem [shape: f32[8,512], index: 6, kind: output, shape index: {}]  }
   0x1   :  { %v2549_v0 = vld [vmem:[%s4117_s0 + $0x10] sm:$0xff]  ;;  %v2554_v1 = vld [vmem:[%s4117_s0] sm:$0xff]  ;;  %v2563_v2 = vld [vmem:[%s4117_s0 + $0x18] sm:$0xff]  ;;  %s2504_s7 = smov 1   ;;  %s2505_s8 = smov 127   ;;  %350 = vmatprep.mubr.f32.mxu0 %v4124_v4  ;;  %421 = vmatprep.mubr.f32.mxu1 %v4124_v4 }
   0x2   :  { %39 = vrot.lane.b32.xlu1 %v2549_v0, %s2501_s25  ;;  %35 = vrot.lane.b32.xlu0 %v2554_v1, %s2501_s25  ;;  %v2568_v3 = vld [vmem:[%s4117_s0 + $0x8] sm:$0xff]  ;;  %s2503_s0 = smov 15   ;;  %s2506_s9 = smov 113   ;;  %v2633_v8 = vand.u32 127, %v43_v5  ;;  %v2656_v18 = vld [vmem:[%s4118_s1] sm:$0xff]  ;;  %vm2960_vm9 = vcmp.lt.s32.totalorder %v43_v5, 512 }
   0x3   :  { %s2507_s10 = smov 112   ;;  %s2509_s11 = smov 111   ;;  %v2640_v11 = vld [vmem:[%s4118_s1 + $0x8] sm:$0xff]  ;;  %v2663_v21 = vld [vmem:[%s4118_s1 + $0x20] sm:$0xff]  ;;  %v2668_v22 = vld [vmem:[%s4118_s1 + $0x18] sm:$0xff] }
   0x4   :  { %vm45_vm0 = vcmp.lt.s32.totalorder %v2633_v8, 17  ;;  %vm70_vm1 = vcmp.lt.s32.totalorder %v2633_v8, 16  ;;  %v2647_v13 = vld [vmem:[%s4118_s1 + $0x28] sm:$0xff]  ;;  %v2677_v25 = vld [vmem:[%s4118_s1 + $0x38] sm:$0xff]  ;;  %v2682_v26 = vld [vmem:[%s4118_s1 + $0x10] sm:$0xff]  ;;  %vm95_vm2 = vcmp.lt.s32.totalorder %v2633_v8, 15 }
   0x5   :  { %v2687_v27 = vld [vmem:[%s4118_s1 + $0x30] sm:$0xff]  ;;  %vm120_vm3 = vcmp.lt.s32.totalorder %v2633_v8, 1  ;;  %v2706_v47 = vld [vmem:[%s4118_s1 + $0x48] sm:$0xff]  ;;  %v2718_v52 = vld [vmem:[%s4118_s1 + $0x40] sm:$0xff]  ;;  %vm149_vm4 = vcmp.lt.s32.totalorder %v2633_v8, 127  ;;  %vm199_vm5 = vcmp.lt.s32.totalorder %v2633_v8, 112 }
   0x6   :  { %41 = vrot.lane.b32.xlu1 %v2563_v2, %s2501_s25  ;;  %37 = vrot.lane.b32.xlu0 %v2568_v3, %s2501_s25  ;;  %v2713_v49 = vld [vmem:[%s4118_s1 + $0x68] sm:$0xff]  ;;  %v2728_v56 = vld [vmem:[%s4118_s1 + $0x50] sm:$0xff]  ;;  %vm174_vm6 = vcmp.lt.s32.totalorder %v2633_v8, 113  ;;  %vm224_vm7 = vcmp.lt.s32.totalorder %v2633_v8, 111 }
   0x7   :  { %v2733_v57 = vld [vmem:[%s4118_s1 + $0x58] sm:$0xff]  ;;  %v2743_v61 = vld [vmem:[%s4118_s1 + $0x60] sm:$0xff]  ;;  %v2748_v62 = vld [vmem:[%s4118_s1 + $0x70] sm:$0xff] }
   0x8   :  { %v2753_v63 = vld [vmem:[%s4118_s1 + $0x78] sm:$0xff] }
   0xa   :  { %64 = vrot.lane.b32.xlu1 %v2568_v3, %s2502_s30  ;;  %62 = vrot.lane.b32.xlu0 %v2554_v1, %s2502_s30 }
   0xe   :  { %68 = vrot.lane.b32.xlu1 %v2563_v2, %s2502_s30  ;;  %66 = vrot.lane.b32.xlu0 %v2549_v0, %s2502_s30 }
  0x12   :  { %89 = vrot.lane.b32.xlu1 %v2568_v3, %s2503_s0  ;;  %87 = vrot.lane.b32.xlu0 %v2554_v1, %s2503_s0 }
  0x16   :  { %93 = vrot.lane.b32.xlu1 %v2563_v2, %s2503_s0  ;;  %91 = vrot.lane.b32.xlu0 %v2549_v0, %s2503_s0 }
  0x1a   :  { %114 = vrot.lane.b32.xlu1 %v2568_v3, %s2504_s7  ;;  %112 = vrot.lane.b32.xlu0 %v2554_v1, %s2504_s7 }
  0x1e   :  { %118 = vrot.lane.b32.xlu1 %v2563_v2, %s2504_s7  ;;  %116 = vrot.lane.b32.xlu0 %v2549_v0, %s2504_s7 }
  0x22   :  { %143 = vrot.lane.b32.xlu1 %v2568_v3, %s2505_s8  ;;  %141 = vrot.lane.b32.xlu0 %v2554_v1, %s2505_s8 }
  0x26   :  { %147 = vrot.lane.b32.xlu1 %v2563_v2, %s2505_s8  ;;  %145 = vrot.lane.b32.xlu0 %v2549_v0, %s2505_s8 }
  0x2a   :  { %168 = vrot.lane.b32.xlu1 %v2568_v3, %s2506_s9  ;;  %166 = vrot.lane.b32.xlu0 %v2554_v1, %s2506_s9 }
  0x2e   :  { %172 = vrot.lane.b32.xlu1 %v2563_v2, %s2506_s9  ;;  %170 = vrot.lane.b32.xlu0 %v2549_v0, %s2506_s9 }
  0x32   :  { %193 = vrot.lane.b32.xlu1 %v2568_v3, %s2507_s10  ;;  %191 = vrot.lane.b32.xlu0 %v2554_v1, %s2507_s10 }
  0x36   :  { %197 = vrot.lane.b32.xlu1 %v2563_v2, %s2507_s10  ;;  %195 = vrot.lane.b32.xlu0 %v2549_v0, %s2507_s10 }
  0x3a   :  { %218 = vrot.lane.b32.xlu1 %v2568_v3, %s2509_s11  ;;  %216 = vrot.lane.b32.xlu0 %v2554_v1, %s2509_s11 }
  0x3e   :  { %222 = vrot.lane.b32.xlu1 %v2563_v2, %s2509_s11  ;;  %220 = vrot.lane.b32.xlu0 %v2549_v0, %s2509_s11 }
  0x74   :  { %v40_v6 = vpop.permute.xlu1 %39  ;;  %v36_v7 = vpop.permute.xlu0 %35 }
  0x78   :  { %v42_v9 = vpop.permute.xlu1 %41  ;;  %v38_v10 = vpop.permute.xlu0 %37 }
  0x79   :  { %v48_v12 = vsel %vm45_vm0, %v36_v7, %v38_v10  ;;  %v49_v16 = vsel %vm45_vm0, %v42_v9, %v36_v7  ;;  %v46_v23 = vsel %vm45_vm0, %v40_v6, %v42_v9  ;;  %v47_v24 = vsel %vm45_vm0, %v38_v10, %v40_v6 }
  0x7a   :  { %v51_v19 = vmul.f32 %v48_v12, %v2640_v11  ;;  %v50_v31 = vmul.f32 %v49_v16, %v2656_v18  ;;  %v53_v34 = vmul.f32 %v46_v23, %v2668_v22  ;;  %v52_v38 = vmul.f32 %v47_v24, %v2682_v26 }
  0x7c   :  { %v65_v14 = vpop.permute.xlu1 %64  ;;  %v63_v15 = vpop.permute.xlu0 %62 }
  0x7d   :  { %v73_v17 = vsel %vm70_vm1, %v63_v15, %v65_v14 }
  0x7e   :  { %v76_v20 = vmul.f32 %v73_v17, %v2647_v13 }
  0x80   :  { %v69_v28 = vpop.permute.xlu1 %68  ;;  %v67_v29 = vpop.permute.xlu0 %66  ;;  %v2159_v30 = vpack.c.bf16 %v76_v20, %v51_v19 }
  0x81   :  { %v74_v32 = vsel %vm70_vm1, %v69_v28, %v63_v15  ;;  %v72_v33 = vsel %vm70_vm1, %v65_v14, %v67_v29  ;;  %v71_v35 = vsel %vm70_vm1, %v67_v29, %v69_v28 }
  0x82   :  { %2160 = vmatprep.subr.bf16.mxu0 %v2159_v30  ;;  %v75_v36 = vmul.f32 %v74_v32, %v2663_v21  ;;  %v78_v37 = vmul.f32 %v71_v35, %v2677_v25  ;;  %v77_v39 = vmul.f32 %v72_v33, %v2687_v27  ;;  %v2771_v32 = vld [vmem:[%s4118_s1 + $0xa0] sm:$0xff]  ;;  %v2783_v35 = vld [vmem:[%s4118_s1 + $0xa8] sm:$0xff] }
  0x84   :  { %v90_v40 = vpop.permute.xlu1 %89  ;;  %v88_v41 = vpop.permute.xlu0 %87  ;;  %v2161_v42 = vpack.c.bf16 %v75_v36, %v50_v31  ;;  %v2179_v43 = vpack.c.bf16 %v78_v37, %v53_v34  ;;  %v2181_v44 = vpack.c.bf16 %v77_v39, %v52_v38  ;;  %v2778_v34 = vld [vmem:[%s4118_s1 + $0xb8] sm:$0xff]  ;;  %v2788_v36 = vld [vmem:[%s4118_s1 + $0xb0] sm:$0xff] }
  0x85   :  { %v98_v48 = vsel %vm95_vm2, %v88_v41, %v90_v40 }
  0x86   :  { %2162 = vmatpush1.bf16.msra.mxu0 %v2161_v42  ;;  %2180 = vmatprep.subr.bf16.mxu1 %v2179_v43  ;;  %v101_v55 = vmul.f32 %v98_v48, %v2706_v47 }
  0x87   :  { %2182 = vmatpush1.bf16.msra.mxu1 %v2181_v44 }
  0x88   :  { %v94_v45 = vpop.permute.xlu1 %93  ;;  %v92_v46 = vpop.permute.xlu0 %91 }
  0x89   :  { %v99_v53 = vsel %vm95_vm2, %v94_v45, %v88_v41  ;;  %v97_v58 = vsel %vm95_vm2, %v90_v40, %v92_v46  ;;  %v96_v60 = vsel %vm95_vm2, %v92_v46, %v94_v45 }
  0x8a   :  { %v100_v6 = vmul.f32 %v99_v53, %v2718_v52  ;;  %v102_v12 = vmul.f32 %v97_v58, %v2728_v56  ;;  %v103_v17 = vmul.f32 %v96_v60, %v2733_v57 }
  0x8c   :  { %v115_v50 = vpop.permute.xlu1 %114  ;;  %v113_v51 = vpop.permute.xlu0 %112 }
  0x8d   :  { %v123_v54 = vsel %vm120_vm3, %v113_v51, %v115_v50 }
  0x8e   :  { %v126_v59 = vmul.f32 %v123_v54, %v2713_v49 }
  0x90   :  { %v119_v7 = vpop.permute.xlu1 %118  ;;  %v117_v9 = vpop.permute.xlu0 %116  ;;  %v2163_v10 = vpack.c.bf16 %v126_v59, %v101_v55 }
  0x91   :  { %v124_v14 = vsel %vm120_vm3, %v119_v7, %v113_v51  ;;  %v121_v15 = vsel %vm120_vm3, %v117_v9, %v119_v7  ;;  %v122_v16 = vsel %vm120_vm3, %v115_v50, %v117_v9  ;;  %v2828_v7 = vld [vmem:[%s4118_s1 + $0xe0] sm:$0xff] }
  0x92   :  { %v125_v19 = vmul.f32 %v124_v14, %v2743_v61  ;;  %v127_v20 = vmul.f32 %v122_v16, %v2748_v62  ;;  %v128_v23 = vmul.f32 %v121_v15, %v2753_v63  ;;  %2164 = vmatprep.subr.bf16.mxu0 %v2163_v10  ;;  %v2842_v14 = vld [vmem:[%s4118_s1 + $0xe8] sm:$0xff]  ;;  %v2847_v15 = vld [vmem:[%s4118_s1 + $0xf0] sm:$0xff]  ;;  %v2852_v16 = vld [vmem:[%s4118_s1 + $0xc0] sm:$0xff] }
  0x94   :  { %v144_v24 = vpop.permute.xlu1 %143  ;;  %v142_v28 = vpop.permute.xlu0 %141  ;;  %v2165_v29 = vpack.c.bf16 %v125_v19, %v100_v6  ;;  %v2183_v30 = vpack.c.bf16 %v128_v23, %v103_v17  ;;  %v2185_v31 = vpack.c.bf16 %v127_v20, %v102_v12  ;;  %v2823_v6 = vld [vmem:[%s4118_s1 + $0xd0] sm:$0xff]  ;;  %v2837_v12 = vld [vmem:[%s4118_s1 + $0xf8] sm:$0xff] }
  0x95   :  { %v152_v33 = vsel %vm149_vm4, %v142_v28, %v144_v24 }
  0x96   :  { %2166 = vmatpush1.bf16.msra.mxu0 %v2165_v29  ;;  %2184 = vmatprep.subr.bf16.mxu1 %v2183_v30  ;;  %v154_v39 = vmul.f32 %v152_v33, %v2771_v32 }
  0x97   :  { %2186 = vmatpush1.bf16.msra.mxu1 %v2185_v31 }
  0x98   :  { %v148_v37 = vpop.permute.xlu1 %147  ;;  %v146_v38 = vpop.permute.xlu0 %145  ;;  %v2169_v54 = vpack.c.bf16 %v154_v39, %v2554_v1  ;;  %v2816_v1 = vld [vmem:[%s4118_s1 + $0xc8] sm:$0xff] }
  0x99   :  { %v153_v40 = vsel %vm149_vm4, %v148_v37, %v142_v28  ;;  %v150_v41 = vsel %vm149_vm4, %v146_v38, %v148_v37  ;;  %v151_v42 = vsel %vm149_vm4, %v144_v24, %v146_v38 }
  0x9a   :  { %v157_v43 = vmul.f32 %v153_v40, %v2778_v34  ;;  %v155_v44 = vmul.f32 %v151_v42, %v2783_v35  ;;  %v156_v45 = vmul.f32 %v150_v41, %v2788_v36 }
  0x9c   :  { %v169_v46 = vpop.permute.xlu1 %168  ;;  %v167_v48 = vpop.permute.xlu0 %166  ;;  %v2167_v50 = vpack.c.bf16 %v155_v44, %v2568_v3  ;;  %v2187_v51 = vpack.c.bf16 %v157_v43, %v2563_v2  ;;  %v2189_v53 = vpack.c.bf16 %v156_v45, %v2549_v0  ;;  %v2809_v2 = vld [vmem:[%s4118_s1 + $0xd8] sm:$0xff] }
  0x9d   :  { %v177_v17 = vsel %vm174_vm6, %v167_v48, %v169_v46 }
  0x9e   :  { %2168 = vmatprep.subr.bf16.mxu0 %v2167_v50  ;;  %2188 = vmatprep.subr.bf16.mxu1 %v2187_v51  ;;  %v179_v40 = vmul.f32 %v177_v17, %v2852_v16  ;;  %v2881_v51 = vld [vmem:[%s4118_s1 + $0x118] sm:$0xff]  ;;  %v2913_v17 = vld [vmem:[%s4118_s1 + $0x130] sm:$0xff] }
  0x9f   :  { %2170 = vmatpush1.bf16.msra.mxu0 %v2169_v54  ;;  %2190 = vmatpush1.bf16.msra.mxu1 %v2189_v53  ;;  %v2886_v53 = vld [vmem:[%s4118_s1 + $0x108] sm:$0xff]  ;;  %v2891_v54 = vld [vmem:[%s4118_s1 + $0x110] sm:$0xff] }
  0xa0   :  { %v173_v55 = vpop.permute.xlu1 %172  ;;  %v171_v58 = vpop.permute.xlu0 %170 }
  0xa1   :  { %v178_v0 = vsel %vm174_vm6, %v173_v55, %v167_v48  ;;  %v176_v3 = vsel %vm174_vm6, %v169_v46, %v171_v58  ;;  %v175_v10 = vsel %vm174_vm6, %v171_v58, %v173_v55  ;;  %v2874_v48 = vld [vmem:[%s4118_s1 + $0x100] sm:$0xff] }
  0xa2   :  { %v182_v19 = vmul.f32 %v178_v0, %v2809_v2  ;;  %v180_v20 = vmul.f32 %v176_v3, %v2816_v1  ;;  %v181_v33 = vmul.f32 %v175_v10, %v2823_v6  ;;  %v2908_v10 = vld [vmem:[%s4118_s1 + $0x138] sm:$0xff] }
  0xa4   :  { %v194_v59 = vpop.permute.xlu1 %193  ;;  %v192_v60 = vpop.permute.xlu0 %191 }
  0xa5   :  { %v202_v9 = vsel %vm199_vm5, %v192_v60, %v194_v59 }
  0xa6   :  { %v204_v28 = vmul.f32 %v202_v9, %v2828_v7  ;;  %v2903_v9 = vld [vmem:[%s4118_s1 + $0x128] sm:$0xff] }
  0xa8   :  { %v198_v23 = vpop.permute.xlu1 %197  ;;  %v196_v24 = vpop.permute.xlu0 %195  ;;  %v2173_v46 = vpack.c.bf16 %v204_v28, %v179_v40 }
  0xa9   :  { %v203_v29 = vsel %vm199_vm5, %v198_v23, %v192_v60  ;;  %v200_v30 = vsel %vm199_vm5, %v196_v24, %v198_v23  ;;  %v201_v31 = vsel %vm199_vm5, %v194_v59, %v196_v24  ;;  %v2921_v24 = vld [vmem:[%s4118_s1 + $0x120] sm:$0xff] }
  0xaa   :  { %v207_v37 = vmul.f32 %v203_v29, %v2837_v12  ;;  %v205_v38 = vmul.f32 %v201_v31, %v2842_v14  ;;  %v206_v39 = vmul.f32 %v200_v30, %v2847_v15 }
  0xac   :  { %v219_v41 = vpop.permute.xlu1 %218  ;;  %v217_v42 = vpop.permute.xlu0 %216  ;;  %v2171_v43 = vpack.c.bf16 %v205_v38, %v180_v20  ;;  %v2191_v44 = vpack.c.bf16 %v207_v37, %v182_v19  ;;  %v2193_v45 = vpack.c.bf16 %v206_v39, %v181_v33  ;;  %v241_v33 = vld [vmem:[%s4119_s2] sm:$0xff] }
  0xad   :  { %v227_v50 = vsel %vm224_vm7, %v217_v42, %v219_v41 }
  0xae   :  { %2172 = vmatprep.subr.bf16.mxu0 %v2171_v43  ;;  %2192 = vmatprep.subr.bf16.mxu1 %v2191_v44  ;;  %v229_v59 = vmul.f32 %v227_v50, %v2874_v48 }
  0xaf   :  { %2174 = vmatpush1.bf16.msra.mxu0 %v2173_v46  ;;  %2194 = vmatpush1.bf16.msra.mxu1 %v2193_v45 }
  0xb0   :  { %v223_v55 = vpop.permute.xlu1 %222  ;;  %v221_v58 = vpop.permute.xlu0 %220  ;;  %v2177_v31 = vpack.c.bf16 %v2921_v24, %v229_v59 }
  0xb1   :  { %v228_v60 = vsel %vm224_vm7, %v223_v55, %v217_v42  ;;  %v225_v0 = vsel %vm224_vm7, %v221_v58, %v223_v55  ;;  %v226_v3 = vsel %vm224_vm7, %v219_v41, %v221_v58 }
  0xb2   :  { %v232_v19 = vmul.f32 %v228_v60, %v2881_v51  ;;  %v230_v20 = vmul.f32 %v226_v3, %v2886_v53  ;;  %v231_v23 = vmul.f32 %v225_v0, %v2891_v54  ;;  %v2510_v3 = vmov 1966171168  }
  0xb4   :  { %v2175_v28 = vpack.c.bf16 %v2903_v9, %v230_v20  ;;  %v2195_v29 = vpack.c.bf16 %v2908_v10, %v232_v19  ;;  %v2197_v30 = vpack.c.bf16 %v2913_v17, %v231_v23  ;;  %v877_v19 = vunpack.c.l.s4 %v2510_v3 }
  0xb5   :  { %v880_v23 = vshrl.u32 %v43_v5, 7 }
  0xb6   :  { %2176 = vmatprep.subr.bf16.mxu0 %v2175_v28  ;;  %2196 = vmatprep.subr.bf16.mxu1 %v2195_v29  ;;  %v878_v20 = vunpack.c.0.s8 %v877_v19 }
  0xb7   :  { %2178 = vmatpush1.bf16.msra.mxu0 %v2177_v31  ;;  %2198 = vmatpush1.bf16.msra.mxu1 %v2197_v30 }
  0xba   :  { %2135 = vmatmul.mubr.msk.f32.vlgmr.msra.gmra.mrb[0].mxu0 %vm282_vm8, %v241_v33  ;;  %2136 = vmatmul.mubr.msk.f32.vlgmr.msra.gmra.mrb[0].mxu1 %vm282_vm8, %v241_v33 }
  0xbb   :  { %764 = vmatprep.mubr.f32.mxu0 %v4124_v4  ;;  %835 = vmatprep.mubr.f32.mxu1 %v4124_v4 }
 0x18d   :  { %v352_v37 = vpop.f32.mrb[0].mxu0  ;;  %v423_v38 = vpop.f32.mrb[0].mxu1 }
 0x18e   :  { %v2137_v39 = vmul.f32 -1.442695, %v352_v37  ;;  %v2139_v40 = vmul.f32 -1.442695, %v423_v38  ;;  %v354_v41 = vpop.f32.mrb[1].mxu0  ;;  %v425_v42 = vpop.f32.mrb[1].mxu1 }
 0x18f   :  { %v2138_v43 = vmul.f32 -1.442695, %v354_v41  ;;  %v2140_v44 = vmul.f32 -1.442695, %v425_v42 }
 0x190   :  { %2401 = vpow2.f32 %v2137_v39 }
 0x191   :  { %2403 = vpow2.f32 %v2139_v40  ;;  %v2939_v40 = vsub.s32 %v878_v20, %v880_v23 }
 0x192   :  { %2405 = vpow2.f32 %v2138_v43 }
 0x193   :  { %2407 = vpow2.f32 %v2140_v44 }
 0x19a   :  { %v2402_v45 = vpop.eup %2401 }
 0x19b   :  { %v2404_v46 = vpop.eup %2403  ;;  %v440_v50 = vadd.f32 1.0, %v2402_v45 }
 0x19c   :  { %v2406_v55 = vpop.eup %2405  ;;  %v442_v58 = vadd.f32 1.0, %v2404_v46 }
 0x19d   :  { %v2408_v59 = vpop.eup %2407  ;;  %2409 = vrcp.f32 %v440_v50  ;;  %v441_v60 = vadd.f32 1.0, %v2406_v55  ;;  %v3782_v50 = vld [vmem:[%s4118_s1 + $0xb8] sm:$0xff] }
 0x19e   :  { %2411 = vrcp.f32 %v442_v58  ;;  %v443_v0 = vadd.f32 1.0, %v2408_v59 }
 0x19f   :  { %2413 = vrcp.f32 %v441_v60 }
 0x1a0   :  { %2415 = vrcp.f32 %v443_v0 }
 0x1a7   :  { %v2410_v28 = vpop.eup %2409 }
 0x1a8   :  { %v2412_v29 = vpop.eup %2411  ;;  %v2935_v30 = vmul.f32 %v2410_v28, %v352_v37 }
 0x1a9   :  { %v2414_v31 = vpop.eup %2413  ;;  %v2937_v33 = vmul.f32 %v2412_v29, %v423_v38 }
 0x1aa   :  { %4168 = vst [vmem:[#allocation4_spill] sm:$0xff] %v2935_v30  ;;  %v2416_v39 = vpop.eup %2415  ;;  %v2941_v43 = vmul.f32 %v2414_v31, %v354_v41  ;;  %460 = vrot.lane.b32.xlu0 %v2935_v30, %s2501_s25 }
 0x1ab   :  { %4169 = vst [vmem:[#allocation5_spill] sm:$0xff] %v2937_v33  ;;  %v2945_v44 = vmul.f32 %v2416_v39, %v425_v42 }
 0x1ac   :  { %4170 = vst [vmem:[#allocation6_spill] sm:$0xff] %v2941_v43  ;;  %v874_v45 = vcombine.low %v2935_v30, %v2941_v43  ;;  %462 = vrot.lane.b32.xlu1 %v2941_v43, %s2501_s25 }
 0x1ad   :  { %4171 = vst [vmem:[#allocation7_spill] sm:$0xff] %v2945_v44  ;;  %v875_v37 = vcombine.low %v2937_v33, %v2945_v44 }
 0x1ae   :  { %v882_v38 = vrot.slane %v874_v45, %v2939_v40  ;;  %464 = vrot.lane.b32.xlu0 %v2937_v33, %s2501_s25 }
 0x1af   :  { %v889_v41 = vrot.slane %v875_v37, %v2939_v40 }
 0x1b0   :  { %466 = vrot.lane.b32.xlu1 %v2945_v44, %s2501_s25 }
 0x1b1   :  { %v890_v42 = vcombine.low %v882_v38, %v889_v41  ;;  %v937_v46 = vcombine.high %v882_v38, %v889_v41 }
 0x1b2   :  { %484 = vrot.lane.b32.xlu0 %v2935_v30, %s2502_s30 }
 0x1b3   :  { %v897_v55 = vrot.slane %v890_v42, %v2939_v40  ;;  %v944_v58 = vrot.slane %v937_v46, %v2939_v40 }
 0x1b4   :  { %486 = vrot.lane.b32.xlu1 %v2941_v43, %s2502_s30 }
 0x1b5   :  { %903 = vst.msk [vmem:[#allocation3] ss:$8 sm:$0xf] %vm2960_vm9, %v897_v55  ;;  %947 = vst.msk [vmem:[#allocation3 + $0x2] ss:$8 sm:$0xf] %vm2960_vm9, %v944_v58  ;;  %v961_v5 = vcombine.high %v897_v55, %v897_v55  ;;  %v971_v59 = vcombine.high %v944_v58, %v944_v58 }
 0x1b6   :  { %488 = vrot.lane.b32.xlu0 %v2937_v33, %s2502_s30 }
 0x1b7   :  { %964 = vst.msk [vmem:[#allocation3 + $0x4] ss:$8 sm:$0xf] %vm2960_vm9, %v961_v5  ;;  %974 = vst.msk [vmem:[#allocation3 + $0x6] ss:$8 sm:$0xf] %vm2960_vm9, %v971_v59 }
 0x1b8   :  { %490 = vrot.lane.b32.xlu1 %v2945_v44, %s2502_s30 }
 0x1ba   :  { %508 = vrot.lane.b32.xlu0 %v2935_v30, %s2503_s0 }
 0x1bc   :  { %510 = vrot.lane.b32.xlu1 %v2941_v43, %s2503_s0 }
 0x1be   :  { %512 = vrot.lane.b32.xlu0 %v2937_v33, %s2503_s0 }
 0x1c0   :  { %514 = vrot.lane.b32.xlu1 %v2945_v44, %s2503_s0 }
 0x1c2   :  { %532 = vrot.lane.b32.xlu0 %v2935_v30, %s2504_s7 }
 0x1c4   :  { %534 = vrot.lane.b32.xlu1 %v2941_v43, %s2504_s7 }
 0x1c6   :  { %536 = vrot.lane.b32.xlu0 %v2937_v33, %s2504_s7 }
 0x1c8   :  { %538 = vrot.lane.b32.xlu1 %v2945_v44, %s2504_s7 }
 0x1ca   :  { %560 = vrot.lane.b32.xlu0 %v2935_v30, %s2505_s8 }
 0x1cc   :  { %562 = vrot.lane.b32.xlu1 %v2941_v43, %s2505_s8 }
 0x1ce   :  { %564 = vrot.lane.b32.xlu0 %v2937_v33, %s2505_s8 }
 0x1d0   :  { %566 = vrot.lane.b32.xlu1 %v2945_v44, %s2505_s8 }
 0x1d2   :  { %584 = vrot.lane.b32.xlu0 %v2935_v30, %s2506_s9 }
 0x1d4   :  { %586 = vrot.lane.b32.xlu1 %v2941_v43, %s2506_s9 }
 0x1d6   :  { %588 = vrot.lane.b32.xlu0 %v2937_v33, %s2506_s9 }
 0x1d8   :  { %590 = vrot.lane.b32.xlu1 %v2945_v44, %s2506_s9 }
 0x1da   :  { %608 = vrot.lane.b32.xlu0 %v2935_v30, %s2507_s10 }
 0x1dc   :  { %610 = vrot.lane.b32.xlu1 %v2941_v43, %s2507_s10 }
 0x1de   :  { %612 = vrot.lane.b32.xlu0 %v2937_v33, %s2507_s10 }
 0x1e0   :  { %614 = vrot.lane.b32.xlu1 %v2945_v44, %s2507_s10 }
 0x1e2   :  { %632 = vrot.lane.b32.xlu0 %v2935_v30, %s2509_s11 }
 0x1e4   :  { %634 = vrot.lane.b32.xlu1 %v2941_v43, %s2509_s11 }
 0x1e6   :  { %636 = vrot.lane.b32.xlu0 %v2937_v33, %s2509_s11 }
 0x1e8   :  { %638 = vrot.lane.b32.xlu1 %v2945_v44, %s2509_s11 }
 0x21c   :  { %v461_v60 = vpop.permute.xlu0 %460 }
 0x21e   :  { %v463_v0 = vpop.permute.xlu1 %462 }
 0x21f   :  { %v3032_v23 = vsel %vm45_vm0, %v461_v60, %v463_v0 }
 0x220   :  { %v465_v3 = vpop.permute.xlu0 %464  ;;  %v473_v31 = vmul.f32 %v3032_v23, %v2640_v11 }
 0x221   :  { %v3056_v42 = vsel %vm45_vm0, %v463_v0, %v465_v3 }
 0x222   :  { %v467_v19 = vpop.permute.xlu1 %466 }
 0x223   :  { %v3044_v37 = vsel %vm45_vm0, %v465_v3, %v467_v19  ;;  %v3048_v38 = vsel %vm45_vm0, %v467_v19, %v461_v60  ;;  %v474_v3 = vmul.f32 %v3056_v42, %v2682_v26 }
 0x224   :  { %v485_v20 = vpop.permute.xlu0 %484  ;;  %v472_v5 = vmul.f32 %v3048_v38, %v2656_v18  ;;  %v475_v59 = vmul.f32 %v3044_v37, %v2668_v22 }
 0x226   :  { %v487_v28 = vpop.permute.xlu1 %486 }
 0x227   :  { %v3036_v29 = vsel %vm70_vm1, %v485_v20, %v487_v28 }
 0x228   :  { %v497_v39 = vmul.f32 %v3036_v29, %v2647_v13  ;;  %v489_v45 = vpop.permute.xlu0 %488 }
 0x229   :  { %v3052_v41 = vsel %vm70_vm1, %v487_v28, %v489_v45 }
 0x22a   :  { %v491_v11 = vpop.permute.xlu1 %490  ;;  %v2199_v46 = vpack.c.bf16 %v497_v39, %v473_v31  ;;  %v498_v13 = vmul.f32 %v3052_v41, %v2687_v27 }
 0x22b   :  { %v3062_v55 = vsel %vm70_vm1, %v489_v45, %v491_v11  ;;  %v3066_v58 = vsel %vm70_vm1, %v491_v11, %v485_v20 }
 0x22c   :  { %v496_v60 = vmul.f32 %v3066_v58, %v2663_v21  ;;  %v499_v27 = vmul.f32 %v3062_v55, %v2677_v25  ;;  %2200 = vmatprep.subr.bf16.mxu0 %v2199_v46  ;;  %v509_v0 = vpop.permute.xlu0 %508  ;;  %v2221_v31 = vpack.c.bf16 %v498_v13, %v474_v3 }
 0x22e   :  { %v2201_v19 = vpack.c.bf16 %v496_v60, %v472_v5  ;;  %v511_v20 = vpop.permute.xlu1 %510  ;;  %v2219_v28 = vpack.c.bf16 %v499_v27, %v475_v59 }
 0x22f   :  { %v518_v21 = vsel %vm95_vm2, %v509_v0, %v511_v20 }
 0x230   :  { %2202 = vmatpush1.bf16.msra.mxu0 %v2201_v19  ;;  %2220 = vmatprep.subr.bf16.mxu1 %v2219_v28  ;;  %v513_v18 = vpop.permute.xlu0 %512  ;;  %v3085_v26 = vmul.f32 %v518_v21, %v2706_v47 }
 0x231   :  { %2222 = vmatpush1.bf16.msra.mxu1 %v2221_v31  ;;  %v517_v60 = vsel %vm95_vm2, %v511_v20, %v513_v18 }
 0x232   :  { %v515_v22 = vpop.permute.xlu1 %514 }
 0x233   :  { %v516_v13 = vsel %vm95_vm2, %v513_v18, %v515_v22  ;;  %v519_v5 = vsel %vm95_vm2, %v515_v22, %v509_v0  ;;  %v3121_v22 = vmul.f32 %v517_v60, %v2728_v56 }
 0x234   :  { %v533_v39 = vpop.permute.xlu0 %532  ;;  %v3111_v28 = vmul.f32 %v519_v5, %v2718_v52  ;;  %v3114_v31 = vmul.f32 %v516_v13, %v2733_v57 }
 0x235   :  { %4178 = vst [vmem:[#allocation12_spill] sm:$0xff] %v3121_v22 }
 0x236   :  { %v535_v45 = vpop.permute.xlu1 %534  ;;  %4177 = vst [vmem:[#allocation11_spill] sm:$0xff] %v3111_v28 }
 0x237   :  { %v3082_v25 = vsel %vm120_vm3, %v533_v39, %v535_v45 }
 0x238   :  { %v545_v11 = vmul.f32 %v3082_v25, %v2713_v49  ;;  %v537_v46 = vpop.permute.xlu0 %536 }
 0x239   :  { %v3095_v59 = vsel %vm120_vm3, %v535_v45, %v537_v46 }
 0x23a   :  { %4174 = vst [vmem:[#allocation8_spill] sm:$0xff] %v3095_v59  ;;  %v539_v27 = vpop.permute.xlu1 %538  ;;  %v2203_v3 = vpack.c.bf16 %v545_v11, %v3085_v26  ;;  %v546_v49 = vmul.f32 %v3095_v59, %v2748_v62 }
 0x23b   :  { %v3104_v19 = vsel %vm120_vm3, %v537_v46, %v539_v27  ;;  %v3108_v0 = vsel %vm120_vm3, %v539_v27, %v533_v39 }
 0x23c   :  { %4175 = vst [vmem:[#allocation9_spill] sm:$0xff] %v3104_v19  ;;  %4176 = vst [vmem:[#allocation10_spill] sm:$0xff] %v3108_v0  ;;  %v544_v20 = vmul.f32 %v3108_v0, %v2743_v61  ;;  %v547_v62 = vmul.f32 %v3104_v19, %v2753_v63  ;;  %2204 = vmatprep.subr.bf16.mxu0 %v2203_v3  ;;  %v561_v18 = vpop.permute.xlu0 %560  ;;  %v2225_v11 = vpack.c.bf16 %v546_v49, %v3121_v22 }
 0x23e   :  { %v2205_v39 = vpack.c.bf16 %v544_v20, %v3111_v28  ;;  %v563_v21 = vpop.permute.xlu1 %562  ;;  %v2223_v45 = vpack.c.bf16 %v547_v62, %v3114_v31 }
 0x23f   :  { %v3128_v46 = vsel %vm149_vm4, %v561_v18, %v563_v21 }
 0x240   :  { %2206 = vmatpush1.bf16.msra.mxu0 %v2205_v39  ;;  %2224 = vmatprep.subr.bf16.mxu1 %v2223_v45  ;;  %v565_v61 = vpop.permute.xlu0 %564  ;;  %v572_v13 = vmul.f32 %v3128_v46, %v2771_v32 }
 0x241   :  { %v3132_v63 = vsel %vm149_vm4, %v563_v21, %v565_v61  ;;  %2226 = vmatpush1.bf16.msra.mxu1 %v2225_v11 }
 0x242   :  { %v573_v5 = vmul.f32 %v3132_v63, %v2783_v35  ;;  %v567_v60 = vpop.permute.xlu1 %566  ;;  %v2209_v35 = vpack.c.bf16 %v572_v13, %v2935_v30 }
 0x243   :  { %v3140_v27 = vsel %vm149_vm4, %v565_v61, %v567_v60  ;;  %v3144_v3 = vsel %vm149_vm4, %v567_v60, %v561_v18 }
 0x244   :  { %v574_v49 = vmul.f32 %v3140_v27, %v2788_v36  ;;  %v575_v20 = vmul.f32 %v3144_v3, %v2778_v34  ;;  %v585_v62 = vpop.permute.xlu0 %584  ;;  %v2207_v32 = vpack.c.bf16 %v573_v5, %v2941_v43 }
 0x246   :  { %v2229_v39 = vpack.c.bf16 %v574_v49, %v2937_v33  ;;  %v587_v21 = vpop.permute.xlu1 %586  ;;  %v2227_v45 = vpack.c.bf16 %v575_v20, %v2945_v44  ;;  %2208 = vmatprep.subr.bf16.mxu0 %v2207_v32 }
 0x247   :  { %2210 = vmatpush1.bf16.msra.mxu0 %v2209_v35  ;;  %v594_v13 = vsel %vm174_vm6, %v585_v62, %v587_v21 }
 0x248   :  { %2228 = vmatprep.subr.bf16.mxu1 %v2227_v45  ;;  %v589_v18 = vpop.permute.xlu0 %588  ;;  %v3181_v45 = vmul.f32 %v594_v13, %v2852_v16 }
 0x249   :  { %2230 = vmatpush1.bf16.msra.mxu1 %v2229_v39  ;;  %v3162_v5 = vsel %vm174_vm6, %v587_v21, %v589_v18 }
 0x24a   :  { %v591_v11 = vpop.permute.xlu1 %590  ;;  %4181 = vst [vmem:[#allocation15_spill] sm:$0xff] %v3181_v45 }
 0x24b   :  { %v3166_v49 = vsel %vm174_vm6, %v589_v18, %v591_v11  ;;  %v3170_v20 = vsel %vm174_vm6, %v591_v11, %v585_v62  ;;  %v597_v18 = vmul.f32 %v3162_v5, %v2816_v1 }
 0x24c   :  { %v609_v36 = vpop.permute.xlu0 %608 }
 0x24e   :  { %v611_v61 = vpop.permute.xlu1 %610 }
 0x24f   :  { %v3156_v34 = vsel %vm199_vm5, %v609_v36, %v611_v61 }
 0x250   :  { %4179 = vst [vmem:[#allocation13_spill] sm:$0xff] %v3156_v34  ;;  %v613_v60 = vpop.permute.xlu0 %612  ;;  %v620_v35 = vmul.f32 %v3156_v34, %v2828_v7  ;;  %v598_v7 = vmul.f32 %v3166_v49, %v2823_v6 }
 0x251   :  { %v3174_v32 = vsel %vm199_vm5, %v611_v61, %v613_v60 }
 0x252   :  { %4180 = vst [vmem:[#allocation14_spill] sm:$0xff] %v3174_v32  ;;  %v621_v39 = vmul.f32 %v3174_v32, %v2842_v14  ;;  %v615_v21 = vpop.permute.xlu1 %614  ;;  %v599_v14 = vmul.f32 %v3170_v20, %v2809_v2 }
 0x253   :  { %v3187_v62 = vsel %vm199_vm5, %v613_v60, %v615_v21  ;;  %v3191_v11 = vsel %vm199_vm5, %v615_v21, %v609_v36  ;;  %v2213_v60 = vpack.c.bf16 %v620_v35, %v3181_v45  ;;  %v1135_v45 = vld [vmem:[%s4118_s1 + $0xf0] sm:$0xff] }
 0x254   :  { %4182 = vst [vmem:[#allocation16_spill] sm:$0xff] %v3187_v62  ;;  %4183 = vst [vmem:[#allocation17_spill] sm:$0xff] %v3191_v11  ;;  %v622_v61 = vmul.f32 %v3187_v62, %v2847_v15  ;;  %v623_v1 = vmul.f32 %v3191_v11, %v2837_v12  ;;  %v633_v13 = vpop.permute.xlu0 %632  ;;  %v2211_v4 = vpack.c.bf16 %v621_v39, %v597_v18  ;;  %v1012_v62 = vld [vmem:[%s4118_s1 + $0x38] sm:$0xff] }
 0x256   :  { %v2233_v34 = vpack.c.bf16 %v622_v61, %v598_v7  ;;  %v635_v32 = vpop.permute.xlu1 %634  ;;  %v2231_v36 = vpack.c.bf16 %v623_v1, %v599_v14  ;;  %2212 = vmatprep.subr.bf16.mxu0 %v2211_v4  ;;  %v656_v14 = vld [vmem:[%s4120_s3] sm:$0xf] }
 0x257   :  { %v3204_v21 = vsel %vm224_vm7, %v633_v13, %v635_v32  ;;  %2214 = vmatpush1.bf16.msra.mxu0 %v2213_v60 }
 0x258   :  { %2232 = vmatprep.subr.bf16.mxu1 %v2231_v36  ;;  %v637_v2 = vpop.permute.xlu0 %636  ;;  %v644_v12 = vmul.f32 %v3204_v21, %v2874_v48 }
 0x259   :  { %v3208_v6 = vsel %vm224_vm7, %v635_v32, %v637_v2  ;;  %2234 = vmatpush1.bf16.msra.mxu1 %v2233_v34 }
 0x25a   :  { %v645_v15 = vmul.f32 %v3208_v6, %v2886_v53  ;;  %v639_v35 = vpop.permute.xlu1 %638  ;;  %v2217_v18 = vpack.c.bf16 %v2921_v24, %v644_v12 }
 0x25b   :  { %v3216_v39 = vsel %vm224_vm7, %v637_v2, %v639_v35  ;;  %v3220_v4 = vsel %vm224_vm7, %v639_v35, %v633_v13 }
 0x25c   :  { %v646_v32 = vmul.f32 %v3216_v39, %v2891_v54  ;;  %v647_v34 = vmul.f32 %v3220_v4, %v2881_v51  ;;  %v2215_v48 = vpack.c.bf16 %v2903_v9, %v645_v15  ;;  %v4184_v51 = vmov 0.0  }
 0x25e   :  { %v2237_v53 = vpack.c.bf16 %v2913_v17, %v646_v32  ;;  %v2235_v7 = vpack.c.bf16 %v2908_v10, %v647_v34  ;;  %2216 = vmatprep.subr.bf16.mxu0 %v2215_v48 }
 0x25f   :  { %2218 = vmatpush1.bf16.msra.mxu0 %v2217_v18 }
 0x260   :  { %2236 = vmatprep.subr.bf16.mxu1 %v2235_v7 }
 0x261   :  { %2238 = vmatpush1.bf16.msra.mxu1 %v2237_v53 }
 0x262   :  { %2141 = vmatmul.mubr.msk.f32.vlgmr.msra.gmra.mrb[2].mxu0 %vm282_vm8, %v656_v14 }
 0x263   :  { %1293 = vmatprep.mubr.f32.mxu0 %v4184_v51 }
 0x264   :  { %2142 = vmatmul.mubr.msk.f32.vlgmr.msra.gmra.mrb[2].mxu1 %vm282_vm8, %v656_v14 }
 0x265   :  { %1364 = vmatprep.mubr.f32.mxu1 %v4184_v51 }
 0x335   :  { %v766_v54 = vpop.f32.mrb[2].mxu0 }
 0x336   :  { %v2143_v9 = vmul.f32 -1.442695, %v766_v54  ;;  %v768_v17 = vpop.f32.mrb[3].mxu0 }
 0x337   :  { %v837_v10 = vpop.f32.mrb[2].mxu1  ;;  %v2144_v24 = vmul.f32 -1.442695, %v768_v17 }
 0x338   :  { %v2145_v61 = vmul.f32 -1.442695, %v837_v10  ;;  %v839_v1 = vpop.f32.mrb[3].mxu1  ;;  %2417 = vpow2.f32 %v2143_v9 }
 0x339   :  { %v2146_v13 = vmul.f32 -1.442695, %v839_v1  ;;  %2419 = vpow2.f32 %v2144_v24 }
 0x33a   :  { %2421 = vpow2.f32 %v2145_v61 }
 0x33b   :  { %2423 = vpow2.f32 %v2146_v13 }
 0x342   :  { %v2418_v60 = vpop.eup %2417 }
 0x343   :  { %v2420_v36 = vpop.eup %2419  ;;  %v854_v2 = vadd.f32 1.0, %v2418_v60 }
 0x344   :  { %v2422_v12 = vpop.eup %2421  ;;  %v855_v15 = vadd.f32 1.0, %v2420_v36 }
 0x345   :  { %v2424_v35 = vpop.eup %2423  ;;  %2425 = vrcp.f32 %v854_v2  ;;  %v856_v32 = vadd.f32 1.0, %v2422_v12 }
 0x346   :  { %2427 = vrcp.f32 %v855_v15  ;;  %v857_v34 = vadd.f32 1.0, %v2424_v35 }
 0x347   :  { %2429 = vrcp.f32 %v856_v32 }
 0x348   :  { %2431 = vrcp.f32 %v857_v34 }
 0x34f   :  { %v2426_v48 = vpop.eup %2425 }
 0x350   :  { %v2428_v18 = vpop.eup %2427  ;;  %v866_v53 = vmul.f32 %v2426_v48, %v766_v54 }
 0x351   :  { %v2430_v7 = vpop.eup %2429  ;;  %v867_v14 = vmul.f32 %v2428_v18, %v768_v17 }
 0x352   :  { %v2432_v51 = vpop.eup %2431  ;;  %v868_v9 = vmul.f32 %v2430_v7, %v837_v10 }
 0x353   :  { %v909_v24 = vcombine.low %v866_v53, %v867_v14  ;;  %v869_v61 = vmul.f32 %v2432_v51, %v839_v1 }
 0x355   :  { %v917_v13 = vrot.slane %v909_v24, %v2939_v40  ;;  %v910_v60 = vcombine.low %v868_v9, %v869_v61 }
 0x357   :  { %v924_v36 = vrot.slane %v910_v60, %v2939_v40 }
 0x359   :  { %v925_v2 = vcombine.low %v917_v13, %v924_v36  ;;  %v949_v12 = vcombine.high %v917_v13, %v924_v36 }
 0x35b   :  { %v932_v15 = vrot.slane %v925_v2, %v2939_v40  ;;  %v956_v35 = vrot.slane %v949_v12, %v2939_v40 }
 0x35d   :  { %935 = vst.msk [vmem:[#allocation3 + $0x1] ss:$8 sm:$0xf] %vm2960_vm9, %v932_v15  ;;  %959 = vst.msk [vmem:[#allocation3 + $0x3] ss:$8 sm:$0xf] %vm2960_vm9, %v956_v35  ;;  %v966_v54 = vcombine.high %v932_v15, %v932_v15  ;;  %v976_v17 = vcombine.high %v956_v35, %v956_v35 }
 0x35e   :  { %v986_v15 = vld [vmem:[%s4118_s1 + $0x8] sm:$0xff] }
 0x35f   :  { %969 = vst.msk [vmem:[#allocation3 + $0x5] ss:$8 sm:$0xf] %vm2960_vm9, %v966_v54  ;;  %979 = vst.msk [vmem:[#allocation3 + $0x7] ss:$8 sm:$0xf] %vm2960_vm9, %v976_v17 }
 0x360   :  { %v1010_v54 = vld [vmem:[%s4118_s1 + $0x28] sm:$0xff] }
 0x366   :  { %v3249_v10 = vld [vmem:[#allocation3] sm:$0xff]  ;;  %v3251_v1 = vld [vmem:[#allocation3 + $0x8] sm:$0xff]  ;;  %v3253_v32 = vld [vmem:[#allocation3 + $0x10] sm:$0xff] }
 0x367   :  { %4185 = vst [vmem:[#allocation18_spill] sm:$0xff] %v3249_v10  ;;  %4186 = vst [vmem:[#allocation19_spill] sm:$0xff] %v3253_v32  ;;  %v3255_v34 = vld [vmem:[#allocation3 + $0x18] sm:$0xff]  ;;  %991 = vrot.lane.b32.xlu1 %v3251_v1, %s2501_s25  ;;  %989 = vrot.lane.b32.xlu0 %v3249_v10, %s2501_s25  ;;  %v1403_v48 = vcombine.low %v3249_v10, %v3251_v1 }
 0x368   :  { %v1404_v18 = vcombine.low %v3253_v32, %v3255_v34 }
 0x369   :  { %v1411_v53 = vrot.slane %v1403_v48, %v2939_v40 }
 0x36a   :  { %v1418_v7 = vrot.slane %v1404_v18, %v2939_v40  ;;  %v985_v18 = vld [vmem:[%s4118_s1] sm:$0xff] }
 0x36b   :  { %995 = vrot.lane.b32.xlu1 %v3255_v34, %s2501_s25  ;;  %993 = vrot.lane.b32.xlu0 %v3253_v32, %s2501_s25 }
 0x36c   :  { %v1419_v14 = vcombine.low %v1411_v53, %v1418_v7  ;;  %v1461_v51 = vcombine.high %v1411_v53, %v1418_v7 }
 0x36e   :  { %v1426_v9 = vrot.slane %v1419_v14, %v2939_v40  ;;  %v1468_v24 = vrot.slane %v1461_v51, %v2939_v40  ;;  %v987_v51 = vld [vmem:[%s4118_s1 + $0x10] sm:$0xff] }
 0x36f   :  { %1015 = vrot.lane.b32.xlu1 %v3251_v1, %s2502_s30  ;;  %1013 = vrot.lane.b32.xlu0 %v3249_v10, %s2502_s30 }
 0x370   :  { %1428 = vst.msk [vmem:[#allocation3] ss:$8 sm:$0xf] %vm2960_vm9, %v1426_v9  ;;  %1470 = vst.msk [vmem:[#allocation3 + $0x2] ss:$8 sm:$0xf] %vm2960_vm9, %v1468_v24  ;;  %v1483_v61 = vcombine.high %v1426_v9, %v1426_v9  ;;  %v1491_v13 = vcombine.high %v1468_v24, %v1468_v24 }
 0x371   :  { %v988_v9 = vld [vmem:[%s4118_s1 + $0x18] sm:$0xff] }
 0x372   :  { %1485 = vst.msk [vmem:[#allocation3 + $0x4] ss:$8 sm:$0xf] %vm2960_vm9, %v1483_v61  ;;  %1493 = vst.msk [vmem:[#allocation3 + $0x6] ss:$8 sm:$0xf] %vm2960_vm9, %v1491_v13 }
 0x373   :  { %1019 = vrot.lane.b32.xlu1 %v3255_v34, %s2502_s30  ;;  %1017 = vrot.lane.b32.xlu0 %v3253_v32, %s2502_s30 }
 0x377   :  { %1039 = vrot.lane.b32.xlu1 %v3251_v1, %s2503_s0  ;;  %1037 = vrot.lane.b32.xlu0 %v3249_v10, %s2503_s0 }
 0x37b   :  { %1043 = vrot.lane.b32.xlu1 %v3255_v34, %s2503_s0  ;;  %1041 = vrot.lane.b32.xlu0 %v3253_v32, %s2503_s0 }
 0x37f   :  { %1063 = vrot.lane.b32.xlu1 %v3251_v1, %s2504_s7  ;;  %1061 = vrot.lane.b32.xlu0 %v3249_v10, %s2504_s7 }
 0x383   :  { %1067 = vrot.lane.b32.xlu1 %v3255_v34, %s2504_s7  ;;  %1065 = vrot.lane.b32.xlu0 %v3253_v32, %s2504_s7 }
 0x387   :  { %1091 = vrot.lane.b32.xlu1 %v3251_v1, %s2505_s8  ;;  %1089 = vrot.lane.b32.xlu0 %v3249_v10, %s2505_s8 }
 0x38b   :  { %1095 = vrot.lane.b32.xlu1 %v3255_v34, %s2505_s8  ;;  %1093 = vrot.lane.b32.xlu0 %v3253_v32, %s2505_s8 }
 0x38f   :  { %1115 = vrot.lane.b32.xlu1 %v3251_v1, %s2506_s9  ;;  %1113 = vrot.lane.b32.xlu0 %v3249_v10, %s2506_s9 }
 0x393   :  { %1119 = vrot.lane.b32.xlu1 %v3255_v34, %s2506_s9  ;;  %1117 = vrot.lane.b32.xlu0 %v3253_v32, %s2506_s9 }
 0x397   :  { %1139 = vrot.lane.b32.xlu1 %v3251_v1, %s2507_s10  ;;  %1137 = vrot.lane.b32.xlu0 %v3249_v10, %s2507_s10 }
 0x39b   :  { %1143 = vrot.lane.b32.xlu1 %v3255_v34, %s2507_s10  ;;  %1141 = vrot.lane.b32.xlu0 %v3253_v32, %s2507_s10 }
 0x39f   :  { %1163 = vrot.lane.b32.xlu1 %v3251_v1, %s2509_s11  ;;  %1161 = vrot.lane.b32.xlu0 %v3249_v10, %s2509_s11 }
 0x3a3   :  { %1167 = vrot.lane.b32.xlu1 %v3255_v34, %s2509_s11  ;;  %1165 = vrot.lane.b32.xlu0 %v3253_v32, %s2509_s11 }
 0x3d9   :  { %v992_v60 = vpop.permute.xlu1 %991  ;;  %v990_v36 = vpop.permute.xlu0 %989 }
 0x3da   :  { %v3342_v35 = vsel %vm45_vm0, %v990_v36, %v992_v60 }
 0x3db   :  { %v1002_v14 = vmul.f32 %v3342_v35, %v986_v15  ;;  %v1011_v15 = vld [vmem:[%s4118_s1 + $0x30] sm:$0xff] }
 0x3dd   :  { %v996_v2 = vpop.permute.xlu1 %995  ;;  %v994_v12 = vpop.permute.xlu0 %993 }
 0x3de   :  { %v3352_v53 = vsel %vm45_vm0, %v996_v2, %v990_v36  ;;  %v3367_v24 = vsel %vm45_vm0, %v992_v60, %v994_v12  ;;  %v3372_v13 = vsel %vm45_vm0, %v994_v12, %v996_v2  ;;  %v1009_v36 = vld [vmem:[%s4118_s1 + $0x20] sm:$0xff] }
 0x3df   :  { %v1001_v60 = vmul.f32 %v3352_v53, %v985_v18  ;;  %v1003_v2 = vmul.f32 %v3367_v24, %v987_v51  ;;  %v1004_v43 = vmul.f32 %v3372_v13, %v988_v9 }
 0x3e1   :  { %v1016_v17 = vpop.permute.xlu1 %1015  ;;  %v1014_v48 = vpop.permute.xlu0 %1013 }
 0x3e2   :  { %v3356_v7 = vsel %vm70_vm1, %v1014_v48, %v1016_v17 }
 0x3e3   :  { %v1026_v61 = vmul.f32 %v3356_v7, %v1010_v54 }
 0x3e5   :  { %v1020_v11 = vpop.permute.xlu1 %1019  ;;  %v1018_v54 = vpop.permute.xlu0 %1017  ;;  %v2239_v33 = vpack.c.bf16 %v1026_v61, %v1002_v14 }
 0x3e6   :  { %v3387_v12 = vsel %vm70_vm1, %v1020_v11, %v1014_v48  ;;  %v3391_v30 = vsel %vm70_vm1, %v1018_v54, %v1020_v11  ;;  %v3395_v44 = vsel %vm70_vm1, %v1016_v17, %v1018_v54 }
 0x3e7   :  { %v1025_v18 = vmul.f32 %v3387_v12, %v1009_v36  ;;  %v1027_v14 = vmul.f32 %v3395_v44, %v1011_v15  ;;  %v1028_v51 = vmul.f32 %v3391_v30, %v1012_v62  ;;  %2240 = vmatprep.subr.bf16.mxu0 %v2239_v33 }
 0x3e9   :  { %v2241_v61 = vpack.c.bf16 %v1025_v18, %v1001_v60  ;;  %v2261_v48 = vpack.c.bf16 %v1027_v14, %v1003_v2  ;;  %v1040_v19 = vpop.permute.xlu1 %1039  ;;  %v1038_v0 = vpop.permute.xlu0 %1037  ;;  %v2259_v59 = vpack.c.bf16 %v1028_v51, %v1004_v43  ;;  %v1033_v18 = vld [vmem:[%s4118_s1 + $0x40] sm:$0xff] }
 0x3ea   :  { %v1047_v11 = vsel %vm95_vm2, %v1038_v0, %v1040_v19 }
 0x3eb   :  { %v3404_v17 = vmul.f32 %v1047_v11, %v2706_v47  ;;  %2242 = vmatpush1.bf16.msra.mxu0 %v2241_v61  ;;  %2260 = vmatprep.subr.bf16.mxu1 %v2259_v59  ;;  %v1034_v59 = vld [vmem:[%s4118_s1 + $0x48] sm:$0xff]  ;;  %v1035_v61 = vld [vmem:[%s4118_s1 + $0x50] sm:$0xff] }
 0x3ec   :  { %2262 = vmatpush1.bf16.msra.mxu1 %v2261_v48  ;;  %v1050_v51 = vmul.f32 %v1047_v11, %v1034_v59  ;;  %v1036_v48 = vld [vmem:[%s4118_s1 + $0x58] sm:$0xff] }
 0x3ed   :  { %v1044_v9 = vpop.permute.xlu1 %1043  ;;  %v1042_v36 = vpop.permute.xlu0 %1041  ;;  %v1060_v11 = vld [vmem:[%s4118_s1 + $0x78] sm:$0xff] }
 0x3ee   :  { %v1048_v33 = vsel %vm95_vm2, %v1044_v9, %v1038_v0  ;;  %v1045_v43 = vsel %vm95_vm2, %v1042_v36, %v1044_v9  ;;  %v1046_v15 = vsel %vm95_vm2, %v1040_v19, %v1042_v36  ;;  %v1058_v0 = vld [vmem:[%s4118_s1 + $0x68] sm:$0xff]  ;;  %v1057_v36 = vld [vmem:[%s4118_s1 + $0x60] sm:$0xff] }
 0x3ef   :  { %v3415_v47 = vmul.f32 %v1048_v33, %v2718_v52  ;;  %v3421_v60 = vmul.f32 %v1046_v15, %v2728_v56  ;;  %v3424_v54 = vmul.f32 %v1045_v43, %v2733_v57  ;;  %v1059_v56 = vld [vmem:[%s4118_s1 + $0x70] sm:$0xff]  ;;  %v1049_v59 = vmul.f32 %v1048_v33, %v1033_v18 }
 0x3f0   :  { %v1051_v22 = vmul.f32 %v1046_v15, %v1035_v61  ;;  %v1052_v28 = vmul.f32 %v1045_v43, %v1036_v48 }
 0x3f1   :  { %4187 = vst [vmem:[#allocation20_spill] sm:$0xff] %v3415_v47  ;;  %4188 = vst [vmem:[#allocation21_spill] sm:$0xff] %v3421_v60  ;;  %v1064_v2 = vpop.permute.xlu1 %1063  ;;  %v1062_v52 = vpop.permute.xlu0 %1061 }
 0x3f2   :  { %v3438_v57 = vsel %vm120_vm3, %v1062_v52, %v1064_v2 }
 0x3f3   :  { %4189 = vst [vmem:[#allocation22_spill] sm:$0xff] %v3438_v57  ;;  %v1074_v9 = vmul.f32 %v3438_v57, %v1058_v0 }
 0x3f5   :  { %v1068_v19 = vpop.permute.xlu1 %1067  ;;  %v1066_v14 = vpop.permute.xlu0 %1065  ;;  %v2243_v62 = vpack.c.bf16 %v1074_v9, %v1050_v51 }
 0x3f6   :  { %v3460_v0 = vsel %vm120_vm3, %v1068_v19, %v1062_v52  ;;  %v3464_v57 = vsel %vm120_vm3, %v1066_v14, %v1068_v19  ;;  %v3468_v60 = vsel %vm120_vm3, %v1064_v2, %v1066_v14  ;;  %v1085_v19 = vld [vmem:[%s4118_s1 + $0xa0] sm:$0xff] }
 0x3f7   :  { %v1073_v47 = vmul.f32 %v3460_v0, %v1057_v36  ;;  %v1075_v33 = vmul.f32 %v3468_v60, %v1059_v56  ;;  %v1076_v18 = vmul.f32 %v3464_v57, %v1060_v11  ;;  %2244 = vmatprep.subr.bf16.mxu0 %v2243_v62  ;;  %v1088_v62 = vld [vmem:[%s4118_s1 + $0xb8] sm:$0xff] }
 0x3f9   :  { %v2245_v15 = vpack.c.bf16 %v1073_v47, %v1049_v59  ;;  %v2265_v51 = vpack.c.bf16 %v1075_v33, %v1051_v22  ;;  %v1092_v52 = vpop.permute.xlu1 %1091  ;;  %v1090_v61 = vpop.permute.xlu0 %1089  ;;  %v2263_v9 = vpack.c.bf16 %v1076_v18, %v1052_v28  ;;  %v1086_v22 = vld [vmem:[%s4118_s1 + $0xa8] sm:$0xff]  ;;  %v1087_v28 = vld [vmem:[%s4118_s1 + $0xb0] sm:$0xff] }
 0x3fa   :  { %v3478_v2 = vsel %vm149_vm4, %v1090_v61, %v1092_v52 }
 0x3fb   :  { %4190 = vst [vmem:[#allocation23_spill] sm:$0xff] %v3478_v2  ;;  %2246 = vmatpush1.bf16.msra.mxu0 %v2245_v15  ;;  %2264 = vmatprep.subr.bf16.mxu1 %v2263_v9  ;;  %v1101_v56 = vmul.f32 %v3478_v2, %v1085_v19 }
 0x3fc   :  { %2266 = vmatpush1.bf16.msra.mxu1 %v2265_v51 }
 0x3fd   :  { %v1096_v43 = vpop.permute.xlu1 %1095  ;;  %v1094_v47 = vpop.permute.xlu0 %1093  ;;  %v2249_v19 = vpack.c.bf16 %v1101_v56, %v3249_v10 }
 0x3fe   :  { %v3492_v14 = vsel %vm149_vm4, %v1096_v43, %v1090_v61  ;;  %v3496_v48 = vsel %vm149_vm4, %v1094_v47, %v1096_v43  ;;  %v3500_v36 = vsel %vm149_vm4, %v1092_v52, %v1094_v47 }
 0x3ff   :  { %4191 = vst [vmem:[#allocation24_spill] sm:$0xff] %v3492_v14  ;;  %4192 = vst [vmem:[#allocation25_spill] sm:$0xff] %v3496_v48  ;;  %v1104_v11 = vmul.f32 %v3492_v14, %v1088_v62  ;;  %v1102_v59 = vmul.f32 %v3500_v36, %v1086_v22  ;;  %v1103_v33 = vmul.f32 %v3496_v48, %v1087_v28  ;;  %v1134_v62 = vld [vmem:[%s4118_s1 + $0xe8] sm:$0xff] }
 0x400   :  { %4193 = vst [vmem:[#allocation26_spill] sm:$0xff] %v3500_v36 }
 0x401   :  { %v2269_v18 = vpack.c.bf16 %v1103_v33, %v3253_v32  ;;  %v1116_v15 = vpop.permute.xlu1 %1115  ;;  %v1114_v51 = vpop.permute.xlu0 %1113  ;;  %v2247_v61 = vpack.c.bf16 %v1102_v59, %v3251_v1  ;;  %v2267_v9 = vpack.c.bf16 %v1104_v11, %v3255_v34 }
 0x402   :  { %v1123_v52 = vsel %vm174_vm6, %v1114_v51, %v1116_v15 }
 0x403   :  { %v3512_v43 = vmul.f32 %v1123_v52, %v2852_v16  ;;  %2248 = vmatprep.subr.bf16.mxu0 %v2247_v61  ;;  %2268 = vmatprep.subr.bf16.mxu1 %v2267_v9  ;;  %v3525_v16 = vld [vmem:[%s4118_s1 + $0xd8] sm:$0xff] }
 0x404   :  { %2250 = vmatpush1.bf16.msra.mxu0 %v2249_v19  ;;  %2270 = vmatpush1.bf16.msra.mxu1 %v2269_v18  ;;  %4195 = vst [vmem:[#allocation28_spill] sm:$0xff] %v3525_v16  ;;  %v3529_v59 = vmul.f32 %v3525_v16, %v3170_v20  ;;  %v3537_v18 = vld [vmem:[%s4118_s1 + $0xc8] sm:$0xff] }
 0x405   :  { %4194 = vst [vmem:[#allocation27_spill] sm:$0xff] %v3512_v43  ;;  %v1120_v22 = vpop.permute.xlu1 %1119  ;;  %v1118_v28 = vpop.permute.xlu0 %1117  ;;  %4198 = vst [vmem:[#allocation31_spill] sm:$0xff] %v3537_v18  ;;  %v1111_v43 = vld [vmem:[%s4118_s1 + $0xd0] sm:$0xff] }
 0x406   :  { %v1124_v47 = vsel %vm174_vm6, %v1120_v22, %v1114_v51  ;;  %v1121_v56 = vsel %vm174_vm6, %v1118_v28, %v1120_v22  ;;  %v1122_v11 = vsel %vm174_vm6, %v1116_v15, %v1118_v28  ;;  %4196 = vst [vmem:[#allocation29_spill] sm:$0xff] %v3529_v59  ;;  %v3541_v15 = vmul.f32 %v3537_v18, %v3162_v5  ;;  %v3546_v51 = vld [vmem:[%s4118_s1 + $0xd0] sm:$0xff]  ;;  %v1112_v28 = vld [vmem:[%s4118_s1 + $0xd8] sm:$0xff]  ;;  %v1133_v5 = vld [vmem:[%s4118_s1 + $0xe0] sm:$0xff] }
 0x407   :  { %v3532_v33 = vmul.f32 %v3525_v16, %v1124_v47  ;;  %4200 = vst [vmem:[#allocation33_spill] sm:$0xff] %v3546_v51  ;;  %v3550_v20 = vmul.f32 %v3546_v51, %v3166_v49  ;;  %v3553_v61 = vmul.f32 %v3537_v18, %v1122_v11  ;;  %v3556_v9 = vmul.f32 %v3546_v51, %v1121_v56  ;;  %v1110_v49 = vld [vmem:[%s4118_s1 + $0xc8] sm:$0xff] }
 0x408   :  { %4199 = vst [vmem:[#allocation32_spill] sm:$0xff] %v3541_v15  ;;  %v1126_v51 = vmul.f32 %v1122_v11, %v1110_v49  ;;  %v1127_v14 = vmul.f32 %v1121_v56, %v1111_v43  ;;  %v3613_v43 = vld [vmem:[%s4118_s1 + $0x100] sm:$0xff] }
 0x409   :  { %4197 = vst [vmem:[#allocation30_spill] sm:$0xff] %v3532_v33  ;;  %4201 = vst [vmem:[#allocation34_spill] sm:$0xff] %v3550_v20  ;;  %v1140_v19 = vpop.permute.xlu1 %1139  ;;  %v1138_v22 = vpop.permute.xlu0 %1137  ;;  %v1136_v33 = vld [vmem:[%s4118_s1 + $0xf8] sm:$0xff]  ;;  %v1109_v20 = vld [vmem:[%s4118_s1 + $0xc0] sm:$0xff] }
 0x40a   :  { %4202 = vst [vmem:[#allocation35_spill] sm:$0xff] %v3553_v61  ;;  %4203 = vst [vmem:[#allocation36_spill] sm:$0xff] %v3556_v9  ;;  %v3578_v59 = vsel %vm199_vm5, %v1138_v22, %v1140_v19  ;;  %v1128_v9 = vmul.f32 %v1124_v47, %v1112_v28 }
 0x40b   :  { %4204 = vst [vmem:[#allocation37_spill] sm:$0xff] %v3578_v59  ;;  %v1149_v18 = vmul.f32 %v3578_v59, %v1133_v5  ;;  %v1125_v5 = vmul.f32 %v1123_v52, %v1109_v20  ;;  %v3628_v52 = vld [vmem:[%s4118_s1 + $0x8] sm:$0xff] }
 0x40c   :  { %v1508_v56 = vmul.f32 %v3628_v52, %v3032_v23  ;;  %v1160_v23 = vld [vmem:[%s4118_s1 + $0x118] sm:$0xff] }
 0x40d   :  { %v1144_v15 = vpop.permute.xlu1 %1143  ;;  %v1142_v61 = vpop.permute.xlu0 %1141  ;;  %v2253_v10 = vpack.c.bf16 %v1149_v18, %v1125_v5  ;;  %v1158_v18 = vld [vmem:[%s4118_s1 + $0x108] sm:$0xff] }
 0x40e   :  { %v3595_v16 = vsel %vm199_vm5, %v1144_v15, %v1138_v22  ;;  %v3599_v48 = vsel %vm199_vm5, %v1142_v61, %v1144_v15  ;;  %v3603_v2 = vsel %vm199_vm5, %v1140_v19, %v1142_v61  ;;  %v3684_v61 = vld [vmem:[%s4118_s1 + $0x110] sm:$0xff] }
 0x40f   :  { %v1152_v47 = vmul.f32 %v3595_v16, %v1136_v33  ;;  %v1150_v11 = vmul.f32 %v3603_v2, %v1134_v62  ;;  %v1151_v28 = vmul.f32 %v3599_v48, %v1135_v45  ;;  %v3617_v62 = vmul.f32 %v3613_v43, %v3204_v21  ;;  %v1157_v45 = vld [vmem:[%s4118_s1 + $0x100] sm:$0xff]  ;;  %v3635_v21 = vld [vmem:[%s4118_s1 + $0x18] sm:$0xff] }
 0x410   :  { %v1510_v33 = vmul.f32 %v3635_v21, %v3044_v37  ;;  %v1159_v37 = vld [vmem:[%s4118_s1 + $0x110] sm:$0xff]  ;;  %v1518_v20 = vmul.f32 %v3635_v21, %v3372_v13 }
 0x411   :  { %v2273_v49 = vpack.c.bf16 %v1151_v28, %v1127_v14  ;;  %v1164_v59 = vpop.permute.xlu1 %1163  ;;  %v1162_v22 = vpop.permute.xlu0 %1161  ;;  %v2251_v36 = vpack.c.bf16 %v1150_v11, %v1126_v51  ;;  %v2271_v32 = vpack.c.bf16 %v1152_v47, %v1128_v9  ;;  %4205 = vst [vmem:[#allocation38_spill] sm:$0xff] %v3617_v62  ;;  %v3660_v51 = vld [vmem:[%s4118_s1 + $0x118] sm:$0xff] }
 0x412   :  { %v1171_v15 = vsel %vm224_vm7, %v1162_v22, %v1164_v59 }
 0x413   :  { %v3623_v14 = vmul.f32 %v3613_v43, %v1171_v15  ;;  %2252 = vmatprep.subr.bf16.mxu0 %v2251_v36  ;;  %2272 = vmatprep.subr.bf16.mxu1 %v2271_v32  ;;  %v3642_v32 = vld [vmem:[%s4118_s1 + $0x108] sm:$0xff]  ;;  %v1173_v47 = vmul.f32 %v1171_v15, %v1157_v45  ;;  %v3693_v15 = vld [vmem:[%s4118_s1] sm:$0xff] }
 0x414   :  { %v3646_v36 = vmul.f32 %v3642_v32, %v3208_v6  ;;  %2254 = vmatpush1.bf16.msra.mxu0 %v2253_v10  ;;  %2274 = vmatpush1.bf16.msra.mxu1 %v2273_v49  ;;  %v3664_v6 = vmul.f32 %v3660_v51, %v3220_v4  ;;  %v1516_v10 = vmul.f32 %v3628_v52, %v3342_v35 }
 0x415   :  { %4206 = vst [vmem:[#allocation39_spill] sm:$0xff] %v3623_v14  ;;  %v1168_v9 = vpop.permute.xlu1 %1167  ;;  %v1166_v19 = vpop.permute.xlu0 %1165 }
 0x416   :  { %v1172_v11 = vsel %vm224_vm7, %v1168_v9, %v1162_v22  ;;  %v1169_v28 = vsel %vm224_vm7, %v1166_v19, %v1168_v9  ;;  %v1170_v4 = vsel %vm224_vm7, %v1164_v59, %v1166_v19  ;;  %v3688_v22 = vmul.f32 %v3684_v61, %v3216_v39  ;;  %v3718_v9 = vld [vmem:[%s4118_s1 + $0x138] sm:$0xff] }
 0x417   :  { %v1176_v5 = vmul.f32 %v1172_v11, %v1160_v23  ;;  %v3679_v35 = vmul.f32 %v3660_v51, %v1172_v11  ;;  %v1174_v13 = vmul.f32 %v1170_v4, %v1158_v18  ;;  %v1175_v49 = vmul.f32 %v1169_v28, %v1159_v37  ;;  %v3706_v18 = vld [vmem:[%s4118_s1 + $0x130] sm:$0xff]  ;;  %v3712_v37 = vld [vmem:[%s4118_s1 + $0x128] sm:$0xff]  ;;  %4211 = vst [vmem:[#allocation44_spill] sm:$0xff] %v3718_v9 }
 0x418   :  { %4207 = vst [vmem:[#allocation40_spill] sm:$0xff] %v3688_v22  ;;  %v1515_v59 = vmul.f32 %v3693_v15, %v3352_v53  ;;  %v3698_v45 = vmul.f32 %v3642_v32, %v1170_v4  ;;  %v3701_v23 = vmul.f32 %v3684_v61, %v1169_v28  ;;  %4209 = vst [vmem:[#allocation42_spill] sm:$0xff] %v3706_v18  ;;  %v3726_v28 = vld [vmem:[%s4118_s1 + $0x10] sm:$0xff] }
 0x419   :  { %v2277_v39 = vpack.c.bf16 %v3706_v18, %v1175_v49  ;;  %4210 = vst [vmem:[#allocation43_spill] sm:$0xff] %v3712_v37  ;;  %v2255_v53 = vpack.c.bf16 %v3712_v37, %v1174_v13  ;;  %v2275_v19 = vpack.c.bf16 %v3718_v9, %v1176_v5  ;;  %v1517_v4 = vmul.f32 %v3726_v28, %v3367_v24  ;;  %v3733_v13 = vld [vmem:[%s4118_s1 + $0x120] sm:$0xff] }
 0x41a   :  { %4208 = vst [vmem:[#allocation41_spill] sm:$0xff] %v3701_v23  ;;  %4212 = vst [vmem:[#allocation45_spill] sm:$0xff] %v3733_v13  ;;  %v2257_v49 = vpack.c.bf16 %v3733_v13, %v1173_v47  ;;  %v2279_v9 = vpack.c.bf16 %v1516_v10, %v1508_v56  ;;  %v2335_v37 = vpack.c.bf16 %v1518_v20, %v1510_v33  ;;  %v1185_v47 = vld [vmem:[%s4121_s4] sm:$0xf] }
 0x41b   :  { %2256 = vmatprep.subr.bf16.mxu0 %v2255_v53  ;;  %2276 = vmatprep.subr.bf16.mxu1 %v2275_v19  ;;  %v1509_v24 = vmul.f32 %v3726_v28, %v3056_v42  ;;  %v1507_v18 = vmul.f32 %v3693_v15, %v3048_v38 }
 0x41c   :  { %2258 = vmatpush1.bf16.msra.mxu0 %v2257_v49  ;;  %2278 = vmatpush1.bf16.msra.mxu1 %v2277_v39 }
 0x41d   :  { %2280 = vmatprep.subr.bf16.mxu0 %v2279_v9  ;;  %2336 = vmatprep.subr.bf16.mxu1 %v2335_v37  ;;  %v2281_v5 = vpack.c.bf16 %v1515_v59, %v1507_v18  ;;  %v2337_v11 = vpack.c.bf16 %v1517_v4, %v1509_v24 }
 0x41e   :  { %v4269_v8 = vld [vmem:[#allocation44_spill] sm:$0xff] }
 0x41f   :  { %2147 = vmatmul.mubr.msk.f32.vlgmr.msra.gmra.mrb[4].mxu0 %vm282_vm8, %v1185_v47  ;;  %2148 = vmatmul.mubr.msk.f32.vlgmr.msra.gmra.mrb[4].mxu1 %vm282_vm8, %v1185_v47 }
 0x420   :  { %2282 = vmatpush1.bf16.msra.mxu0 %v2281_v5  ;;  %2338 = vmatpush1.bf16.msra.mxu1 %v2337_v11 }
 0x4f2   :  { %v1295_v42 = vpop.f32.mrb[4].mxu0  ;;  %v1366_v56 = vpop.f32.mrb[4].mxu1 }
 0x4f3   :  { %v2149_v33 = vmul.f32 -1.442695, %v1295_v42  ;;  %v2151_v38 = vmul.f32 -1.442695, %v1366_v56  ;;  %v1297_v10 = vpop.f32.mrb[5].mxu0  ;;  %v1368_v20 = vpop.f32.mrb[5].mxu1 }
 0x4f4   :  { %v2150_v39 = vmul.f32 -1.442695, %v1297_v10  ;;  %v2152_v53 = vmul.f32 -1.442695, %v1368_v20 }
 0x4f5   :  { %2433 = vpow2.f32 %v2149_v33 }
 0x4f6   :  { %2435 = vpow2.f32 %v2151_v38 }
 0x4f7   :  { %2437 = vpow2.f32 %v2150_v39 }
 0x4f8   :  { %2439 = vpow2.f32 %v2152_v53 }
 0x4ff   :  { %v2434_v59 = vpop.eup %2433 }
 0x500   :  { %v2436_v18 = vpop.eup %2435  ;;  %v1383_v37 = vadd.f32 1.0, %v2434_v59 }
 0x501   :  { %v2438_v9 = vpop.eup %2437  ;;  %v1385_v19 = vadd.f32 1.0, %v2436_v18 }
 0x502   :  { %v2440_v4 = vpop.eup %2439  ;;  %2441 = vrcp.f32 %v1383_v37  ;;  %v1384_v11 = vadd.f32 1.0, %v2438_v9 }
 0x503   :  { %2443 = vrcp.f32 %v1385_v19  ;;  %v1386_v49 = vadd.f32 1.0, %v2440_v4 }
 0x504   :  { %2445 = vrcp.f32 %v1384_v11 }
 0x505   :  { %2447 = vrcp.f32 %v1386_v49 }
 0x50c   :  { %v2442_v5 = vpop.eup %2441 }
 0x50d   :  { %v2444_v24 = vpop.eup %2443  ;;  %v1395_v47 = vmul.f32 %v2442_v5, %v1295_v42 }
 0x50e   :  { %v2446_v13 = vpop.eup %2445  ;;  %v1397_v33 = vmul.f32 %v2444_v24, %v1366_v56 }
 0x50f   :  { %v2448_v38 = vpop.eup %2447  ;;  %v1396_v39 = vmul.f32 %v2446_v13, %v1297_v10  ;;  %v3786_v10 = vmul.f32 %v3782_v50, %v3144_v3 }
 0x510   :  { %v1398_v53 = vmul.f32 %v2448_v38, %v1368_v20 }
 0x511   :  { %v1434_v22 = vcombine.low %v1395_v47, %v1396_v39 }
 0x512   :  { %v1435_v23 = vcombine.low %v1397_v33, %v1398_v53  ;;  %v1840_v33 = vld [vmem:[%s4122_s5 + $0x8] sm:$0xff] }
 0x513   :  { %v1442_v59 = vrot.slane %v1434_v22, %v2939_v40  ;;  %v3764_v22 = vld [vmem:[%s4118_s1 + $0xa0] sm:$0xff]  ;;  %2153 = vmatprep.mubr.msk.f32.mxu0 %vm1953_vm10, %v1840_v33  ;;  %2154 = vmatprep.mubr.msk.f32.mxu1 %vm1953_vm10, %v1840_v33 }
 0x514   :  { %v1449_v18 = vrot.slane %v1435_v23, %v2939_v40  ;;  %v3773_v23 = vld [vmem:[%s4118_s1 + $0xa8] sm:$0xff]  ;;  %v2486_v33 = vld [vmem:[%s4118_s1 + $0x20] sm:$0xff] }
 0x515   :  { %v3777_v56 = vmul.f32 %v3773_v23, %v3132_v63  ;;  %v1547_v47 = vmul.f32 %v2486_v33, %v3066_v58 }
 0x516   :  { %v1450_v37 = vcombine.low %v1442_v59, %v1449_v18  ;;  %v1472_v9 = vcombine.high %v1442_v59, %v1449_v18  ;;  %v2484_v59 = vld [vmem:[%s4118_s1 + $0x28] sm:$0xff] }
 0x517   :  { %v1548_v18 = vmul.f32 %v2484_v59, %v3036_v29 }
 0x518   :  { %v1457_v19 = vrot.slane %v1450_v37, %v2939_v40  ;;  %v1479_v4 = vrot.slane %v1472_v9, %v2939_v40  ;;  %v3768_v40 = vmul.f32 %v3764_v22, %v3128_v46  ;;  %v3791_v46 = vld [vmem:[%s4118_s1 + $0xb0] sm:$0xff] }
 0x519   :  { %v3795_v20 = vmul.f32 %v3791_v46, %v3140_v27  ;;  %v2485_v9 = vld [vmem:[%s4118_s1 + $0x30] sm:$0xff] }
 0x51a   :  { %1459 = vst.msk [vmem:[#allocation3 + $0x1] ss:$8 sm:$0xf] %vm2960_vm9, %v1457_v19  ;;  %1481 = vst.msk [vmem:[#allocation3 + $0x3] ss:$8 sm:$0xf] %vm2960_vm9, %v1479_v4  ;;  %v1487_v13 = vcombine.high %v1457_v19, %v1457_v19  ;;  %v1495_v42 = vcombine.high %v1479_v4, %v1479_v4  ;;  %v1549_v19 = vmul.f32 %v2485_v9, %v3052_v41 }
 0x51b   :  { %v2487_v41 = vld [vmem:[%s4118_s1 + $0x38] sm:$0xff] }
 0x51c   :  { %1489 = vst.msk [vmem:[#allocation3 + $0x5] ss:$8 sm:$0xf] %vm2960_vm9, %v1487_v13  ;;  %1497 = vst.msk [vmem:[#allocation3 + $0x7] ss:$8 sm:$0xf] %vm2960_vm9, %v1495_v42 }
 0x523   :  { %v3797_v63 = vld [vmem:[#allocation3 + $0x8] sm:$0xff]  ;;  %v3799_v11 = vld [vmem:[#allocation3] sm:$0xff]  ;;  %v3801_v49 = vld [vmem:[#allocation3 + $0x18] sm:$0xff] }
 0x524   :  { %1525 = vrot.lane.b32.xlu1 %v3797_v63, %s2501_s25  ;;  %1523 = vrot.lane.b32.xlu0 %v3799_v11, %s2501_s25  ;;  %v3807_v3 = vld [vmem:[#allocation3 + $0x10] sm:$0xff] }
 0x528   :  { %1529 = vrot.lane.b32.xlu1 %v3801_v49, %s2501_s25  ;;  %1527 = vrot.lane.b32.xlu0 %v3807_v3, %s2501_s25 }
 0x52c   :  { %1565 = vrot.lane.b32.xlu1 %v3797_v63, %s2502_s30  ;;  %1563 = vrot.lane.b32.xlu0 %v3799_v11, %s2502_s30 }
 0x530   :  { %1569 = vrot.lane.b32.xlu1 %v3801_v49, %s2502_s30  ;;  %1567 = vrot.lane.b32.xlu0 %v3807_v3, %s2502_s30 }
 0x534   :  { %1605 = vrot.lane.b32.xlu1 %v3797_v63, %s2503_s0  ;;  %1603 = vrot.lane.b32.xlu0 %v3799_v11, %s2503_s0 }
 0x538   :  { %1609 = vrot.lane.b32.xlu1 %v3801_v49, %s2503_s0  ;;  %1607 = vrot.lane.b32.xlu0 %v3807_v3, %s2503_s0 }
 0x53c   :  { %1645 = vrot.lane.b32.xlu1 %v3797_v63, %s2504_s7  ;;  %1643 = vrot.lane.b32.xlu0 %v3799_v11, %s2504_s7 }
 0x540   :  { %1649 = vrot.lane.b32.xlu1 %v3801_v49, %s2504_s7  ;;  %1647 = vrot.lane.b32.xlu0 %v3807_v3, %s2504_s7 }
 0x544   :  { %1697 = vrot.lane.b32.xlu1 %v3797_v63, %s2505_s8  ;;  %1695 = vrot.lane.b32.xlu0 %v3799_v11, %s2505_s8 }
 0x548   :  { %1701 = vrot.lane.b32.xlu1 %v3801_v49, %s2505_s8  ;;  %1699 = vrot.lane.b32.xlu0 %v3807_v3, %s2505_s8 }
 0x54c   :  { %1737 = vrot.lane.b32.xlu1 %v3797_v63, %s2506_s9  ;;  %1735 = vrot.lane.b32.xlu0 %v3799_v11, %s2506_s9 }
 0x550   :  { %1741 = vrot.lane.b32.xlu1 %v3801_v49, %s2506_s9  ;;  %1739 = vrot.lane.b32.xlu0 %v3807_v3, %s2506_s9 }
 0x554   :  { %1777 = vrot.lane.b32.xlu1 %v3797_v63, %s2507_s10  ;;  %1775 = vrot.lane.b32.xlu0 %v3799_v11, %s2507_s10 }
 0x558   :  { %1781 = vrot.lane.b32.xlu1 %v3801_v49, %s2507_s10  ;;  %1779 = vrot.lane.b32.xlu0 %v3807_v3, %s2507_s10 }
 0x55c   :  { %1817 = vrot.lane.b32.xlu1 %v3797_v63, %s2509_s11  ;;  %1815 = vrot.lane.b32.xlu0 %v3799_v11, %s2509_s11 }
 0x560   :  { %1821 = vrot.lane.b32.xlu1 %v3801_v49, %s2509_s11  ;;  %1819 = vrot.lane.b32.xlu0 %v3807_v3, %s2509_s11 }
 0x596   :  { %v1526_v38 = vpop.permute.xlu1 %1525  ;;  %v1524_v39 = vpop.permute.xlu0 %1523 }
 0x597   :  { %v1533_v53 = vsel %vm45_vm0, %v1524_v39, %v1526_v38 }
 0x598   :  { %v1536_v37 = vmul.f32 %v3628_v52, %v1533_v53 }
 0x59a   :  { %v1530_v4 = vpop.permute.xlu1 %1529  ;;  %v1528_v13 = vpop.permute.xlu0 %1527  ;;  %v2283_v42 = vpack.c.bf16 %v1548_v18, %v1536_v37  ;;  %v1550_v18 = vmul.f32 %v2487_v41, %v3062_v55  ;;  %v1555_v55 = vmul.f32 %v2486_v33, %v3387_v12 }
 0x59b   :  { %v1534_v29 = vsel %vm45_vm0, %v1530_v4, %v1524_v39  ;;  %v1531_v52 = vsel %vm45_vm0, %v1528_v13, %v1530_v4  ;;  %v1532_v53 = vsel %vm45_vm0, %v1526_v38, %v1528_v13  ;;  %v1556_v13 = vmul.f32 %v2484_v59, %v3356_v7 }
 0x59c   :  { %v1535_v37 = vmul.f32 %v3693_v15, %v1534_v29  ;;  %v1537_v24 = vmul.f32 %v3726_v28, %v1532_v53  ;;  %v1538_v58 = vmul.f32 %v3635_v21, %v1531_v52  ;;  %2284 = vmatprep.subr.bf16.mxu0 %v2283_v42 }
 0x59e   :  { %v2285_v39 = vpack.c.bf16 %v1547_v47, %v1535_v37  ;;  %v2341_v27 = vpack.c.bf16 %v1549_v19, %v1537_v24  ;;  %v1566_v5 = vpop.permute.xlu1 %1565  ;;  %v1564_v4 = vpop.permute.xlu0 %1563  ;;  %v2339_v62 = vpack.c.bf16 %v1550_v18, %v1538_v58  ;;  %v1557_v47 = vmul.f32 %v2485_v9, %v3395_v44  ;;  %v2488_v18 = vld [vmem:[%s4118_s1 + $0x68] sm:$0xff]  ;;  %v4214_v37 = vld [vmem:[#allocation8_spill] sm:$0xff] }
 0x59f   :  { %v1573_v38 = vsel %vm70_vm1, %v1564_v4, %v1566_v5 }
 0x5a0   :  { %v1576_v14 = vmul.f32 %v2484_v59, %v1573_v38  ;;  %2286 = vmatpush1.bf16.msra.mxu0 %v2285_v39  ;;  %2340 = vmatprep.subr.bf16.mxu1 %v2339_v62  ;;  %v1558_v59 = vmul.f32 %v2487_v41, %v3391_v30  ;;  %v2489_v30 = vld [vmem:[%s4118_s1 + $0x48] sm:$0xff] }
 0x5a1   :  { %2342 = vmatpush1.bf16.msra.mxu1 %v2341_v27 }
 0x5a2   :  { %v1570_v15 = vpop.permute.xlu1 %1569  ;;  %v1568_v28 = vpop.permute.xlu0 %1567  ;;  %v2287_v21 = vpack.c.bf16 %v1576_v14, %v1556_v13  ;;  %v2491_v13 = vld [vmem:[%s4118_s1 + $0x60] sm:$0xff] }
 0x5a3   :  { %v1574_v24 = vsel %vm70_vm1, %v1570_v15, %v1564_v4  ;;  %v1571_v19 = vsel %vm70_vm1, %v1568_v28, %v1570_v15  ;;  %v1572_v7 = vsel %vm70_vm1, %v1566_v5, %v1568_v28  ;;  %v1628_v5 = vmul.f32 %v2488_v18, %v3082_v25 }
 0x5a4   :  { %v1575_v62 = vmul.f32 %v2486_v33, %v1574_v24  ;;  %v1577_v27 = vmul.f32 %v2485_v9, %v1572_v7  ;;  %v1578_v42 = vmul.f32 %v2487_v41, %v1571_v19  ;;  %2288 = vmatprep.subr.bf16.mxu0 %v2287_v21  ;;  %v4213_v33 = vpack.c.bf16 %v3404_v17, %v3085_v26  ;;  %v2490_v41 = vld [vmem:[%s4118_s1 + $0x70] sm:$0xff] }
 0x5a5   :  { %v1629_v58 = vmul.f32 %v2490_v41, %v4214_v37  ;;  %v4215_v25 = vpack.c.bf16 %v3424_v54, %v3114_v31  ;;  %v4216_v26 = vld [vmem:[#allocation10_spill] sm:$0xff]  ;;  %v2492_v31 = vld [vmem:[%s4118_s1 + $0x78] sm:$0xff]  ;;  %v4217_v54 = vld [vmem:[#allocation9_spill] sm:$0xff] }
 0x5a6   :  { %v2289_v12 = vpack.c.bf16 %v1575_v62, %v1555_v55  ;;  %v2345_v29 = vpack.c.bf16 %v1577_v27, %v1557_v47  ;;  %v1606_v14 = vpop.permute.xlu1 %1605  ;;  %v1604_v52 = vpop.permute.xlu0 %1603  ;;  %v2343_v44 = vpack.c.bf16 %v1578_v42, %v1558_v59  ;;  %v1627_v17 = vmul.f32 %v2491_v13, %v4216_v26  ;;  %v2493_v47 = vld [vmem:[%s4118_s1 + $0x40] sm:$0xff]  ;;  %v2494_v19 = vld [vmem:[%s4118_s1 + $0x50] sm:$0xff]  ;;  %v2495_v59 = vld [vmem:[%s4118_s1 + $0x58] sm:$0xff] }
 0x5a7   :  { %v1613_v53 = vsel %vm95_vm2, %v1604_v52, %v1606_v14  ;;  %v1630_v21 = vmul.f32 %v2492_v31, %v4217_v54  ;;  %v4218_v27 = vld [vmem:[#allocation20_spill] sm:$0xff]  ;;  %v4219_v42 = vld [vmem:[#allocation11_spill] sm:$0xff]  ;;  %v4224_v37 = vld [vmem:[#allocation22_spill] sm:$0xff] }
 0x5a8   :  { %v1616_v9 = vmul.f32 %v2489_v30, %v1613_v53  ;;  %2290 = vmatpush1.bf16.msra.mxu0 %v2289_v12  ;;  %2344 = vmatprep.subr.bf16.mxu1 %v2343_v44  ;;  %v4220_v12 = vpack.c.bf16 %v4218_v27, %v4219_v42  ;;  %v4226_v27 = vld [vmem:[#allocation7_spill] sm:$0xff] }
 0x5a9   :  { %2292 = vmatprep.subr.bf16.mxu0 %v4213_v33  ;;  %2346 = vmatpush1.bf16.msra.mxu1 %v2345_v29  ;;  %v4221_v29 = vld [vmem:[#allocation21_spill] sm:$0xff]  ;;  %v2359_v42 = vpack.c.bf16 %v3255_v34, %v4226_v27  ;;  %v2497_v27 = vld [vmem:[%s4118_s1 + $0xf8] sm:$0xff] }
 0x5aa   :  { %v1610_v39 = vpop.permute.xlu1 %1609  ;;  %2348 = vmatprep.subr.bf16.mxu1 %v4215_v25  ;;  %v1608_v4 = vpop.permute.xlu0 %1607  ;;  %v2295_v38 = vpack.c.bf16 %v1628_v5, %v1616_v9 }
 0x5ab   :  { %v1614_v55 = vsel %vm95_vm2, %v1610_v39, %v1604_v52  ;;  %v1611_v15 = vsel %vm95_vm2, %v1608_v4, %v1610_v39  ;;  %v1612_v28 = vsel %vm95_vm2, %v1606_v14, %v1608_v4  ;;  %v4222_v14 = vld [vmem:[#allocation12_spill] sm:$0xff]  ;;  %v1636_v39 = vmul.f32 %v2488_v18, %v4224_v37 }
 0x5ac   :  { %v1615_v24 = vmul.f32 %v2493_v47, %v1614_v55  ;;  %v1617_v7 = vmul.f32 %v2494_v19, %v1612_v28  ;;  %v1618_v62 = vmul.f32 %v2495_v59, %v1611_v15  ;;  %2294 = vmatpush1.bf16.msra.mxu0 %v4220_v12  ;;  %v4223_v52 = vpack.c.bf16 %v4221_v29, %v4222_v14  ;;  %v4225_v59 = vld [vmem:[#allocation6_spill] sm:$0xff]  ;;  %v4229_v29 = vld [vmem:[#allocation5_spill] sm:$0xff]  ;;  %v4230_v14 = vld [vmem:[#allocation19_spill] sm:$0xff] }
 0x5ad   :  { %2296 = vmatprep.subr.bf16.mxu0 %v2295_v38  ;;  %v1635_v4 = vmul.f32 %v2491_v13, %v3460_v0  ;;  %v4232_v37 = vpack.c.bf16 %v3777_v56, %v3797_v63  ;;  %v4236_v56 = vld [vmem:[#allocation25_spill] sm:$0xff] }
 0x5ae   :  { %2350 = vmatpush1.bf16.msra.mxu1 %v4223_v52  ;;  %v2297_v44 = vpack.c.bf16 %v1627_v17, %v1615_v24  ;;  %v2353_v53 = vpack.c.bf16 %v1629_v58, %v1617_v7  ;;  %v1646_v5 = vpop.permute.xlu1 %1645  ;;  %v1644_v30 = vpop.permute.xlu0 %1643  ;;  %v2351_v9 = vpack.c.bf16 %v1630_v21, %v1618_v62  ;;  %v1637_v17 = vmul.f32 %v2490_v41, %v3468_v60 }
 0x5af   :  { %v1653_v33 = vsel %vm120_vm3, %v1644_v30, %v1646_v5  ;;  %v2303_v62 = vpack.c.bf16 %v3251_v1, %v4225_v59  ;;  %v2361_v52 = vpack.c.bf16 %v4230_v14, %v4229_v29  ;;  %v1689_v63 = vmul.f32 %v3791_v46, %v4236_v56  ;;  %v4243_v59 = vld [vmem:[#allocation32_spill] sm:$0xff]  ;;  %v4247_v14 = vld [vmem:[#allocation30_spill] sm:$0xff] }
 0x5b0   :  { %v1656_v25 = vmul.f32 %v2488_v18, %v1653_v33  ;;  %2298 = vmatpush1.bf16.msra.mxu0 %v2297_v44  ;;  %2352 = vmatprep.subr.bf16.mxu1 %v2351_v9  ;;  %v1638_v18 = vmul.f32 %v2492_v31, %v3464_v57 }
 0x5b2   :  { %2354 = vmatpush1.bf16.msra.mxu1 %v2353_v53  ;;  %v1650_v38 = vpop.permute.xlu1 %1649  ;;  %v1648_v26 = vpop.permute.xlu0 %1647  ;;  %v2299_v55 = vpack.c.bf16 %v1656_v25, %v1636_v39  ;;  %v4233_v39 = vld [vmem:[#allocation24_spill] sm:$0xff] }
 0x5b3   :  { %v1654_v58 = vsel %vm120_vm3, %v1650_v38, %v1644_v30  ;;  %v1651_v15 = vsel %vm120_vm3, %v1648_v26, %v1650_v38  ;;  %v1652_v28 = vsel %vm120_vm3, %v1646_v5, %v1648_v26  ;;  %v4231_v5 = vld [vmem:[#allocation26_spill] sm:$0xff]  ;;  %v1690_v25 = vmul.f32 %v3782_v50, %v4233_v39 }
 0x5b4   :  { %v1655_v54 = vmul.f32 %v2491_v13, %v1654_v58  ;;  %v1657_v21 = vmul.f32 %v2490_v41, %v1652_v28  ;;  %v1658_v47 = vmul.f32 %v2492_v31, %v1651_v15  ;;  %2300 = vmatprep.subr.bf16.mxu0 %v2299_v55  ;;  %v4227_v13 = vld [vmem:[#allocation4_spill] sm:$0xff]  ;;  %v4228_v31 = vld [vmem:[#allocation18_spill] sm:$0xff]  ;;  %v1688_v30 = vmul.f32 %v3773_v23, %v4231_v5  ;;  %v4235_v58 = vld [vmem:[#allocation23_spill] sm:$0xff] }
 0x5b5   :  { %v2305_v12 = vpack.c.bf16 %v4228_v31, %v4227_v13  ;;  %v4234_v55 = vpack.c.bf16 %v3786_v10, %v3801_v49  ;;  %v1687_v15 = vmul.f32 %v3764_v22, %v4235_v58  ;;  %v4246_v31 = vld [vmem:[#allocation33_spill] sm:$0xff]  ;;  %v1770_v58 = vmul.f32 %v2497_v27, %v3595_v16 }
 0x5b6   :  { %v2301_v0 = vpack.c.bf16 %v1655_v54, %v1635_v4  ;;  %v2357_v24 = vpack.c.bf16 %v1657_v21, %v1637_v17  ;;  %v1698_v19 = vpop.permute.xlu1 %1697  ;;  %v1696_v7 = vpop.permute.xlu0 %1695  ;;  %v2355_v60 = vpack.c.bf16 %v1658_v47, %v1638_v18  ;;  %v4238_v18 = vpack.c.bf16 %v3795_v20, %v3807_v3  ;;  %v2496_v20 = vld [vmem:[%s4118_s1 + $0xe8] sm:$0xff]  ;;  %v4239_v3 = vld [vmem:[#allocation14_spill] sm:$0xff] }
 0x5b7   :  { %v1705_v44 = vsel %vm149_vm4, %v1696_v7, %v1698_v19  ;;  %v1760_v47 = vmul.f32 %v2496_v20, %v4239_v3  ;;  %v4250_v5 = vld [vmem:[#allocation13_spill] sm:$0xff] }
 0x5b8   :  { %2302 = vmatpush1.bf16.msra.mxu0 %v2301_v0  ;;  %2356 = vmatprep.subr.bf16.mxu1 %v2355_v60  ;;  %v1707_v4 = vmul.f32 %v3764_v22, %v1705_v44  ;;  %v4240_v0 = vld [vmem:[#allocation28_spill] sm:$0xff]  ;;  %v4242_v60 = vld [vmem:[#allocation35_spill] sm:$0xff] }
 0x5b9   :  { %2304 = vmatprep.subr.bf16.mxu0 %v2303_v62  ;;  %2358 = vmatpush1.bf16.msra.mxu1 %v2357_v24  ;;  %v4244_v62 = vpack.c.bf16 %v4242_v60, %v4243_v59  ;;  %v4260_v59 = vpack.c.bf16 %v3698_v45, %v3646_v36  ;;  %v4262_v36 = vld [vmem:[#allocation38_spill] sm:$0xff] }
 0x5ba   :  { %v1702_v57 = vpop.permute.xlu1 %1701  ;;  %2360 = vmatprep.subr.bf16.mxu1 %v2359_v42  ;;  %v1700_v41 = vpop.permute.xlu0 %1699  ;;  %v2313_v10 = vpack.c.bf16 %v1707_v4, %v1687_v15  ;;  %v4245_v42 = vld [vmem:[#allocation17_spill] sm:$0xff]  ;;  %v4253_v4 = vld [vmem:[#allocation15_spill] sm:$0xff]  ;;  %v1768_v15 = vmul.f32 %v2496_v20, %v3603_v2 }
 0x5bb   :  { %v1706_v1 = vsel %vm149_vm4, %v1702_v57, %v1696_v7  ;;  %v1703_v34 = vsel %vm149_vm4, %v1700_v41, %v1702_v57  ;;  %v1704_v53 = vsel %vm149_vm4, %v1698_v19, %v1700_v41  ;;  %v4241_v19 = vld [vmem:[#allocation31_spill] sm:$0xff]  ;;  %v1762_v57 = vmul.f32 %v2497_v27, %v4245_v42  ;;  %v2498_v41 = vld [vmem:[%s4118_s1 + $0xc0] sm:$0xff] }
 0x5bc   :  { %v1710_v9 = vmul.f32 %v3782_v50, %v1706_v1  ;;  %v1708_v33 = vmul.f32 %v3773_v23, %v1704_v53  ;;  %2306 = vmatpush1.bf16.msra.mxu0 %v2305_v12  ;;  %v1709_v38 = vmul.f32 %v3791_v46, %v1703_v34  ;;  %v4237_v50 = vpack.c.bf16 %v3768_v40, %v3799_v11  ;;  %v2499_v53 = vld [vmem:[%s4118_s1 + $0xe0] sm:$0xff] }
 0x5bd   :  { %2308 = vmatprep.subr.bf16.mxu0 %v4232_v37  ;;  %2362 = vmatpush1.bf16.msra.mxu1 %v2361_v52  ;;  %v4248_v52 = vld [vmem:[#allocation29_spill] sm:$0xff] }
 0x5be   :  { %v1738_v26 = vpop.permute.xlu1 %1737  ;;  %2364 = vmatprep.subr.bf16.mxu1 %v4234_v55  ;;  %v1736_v17 = vpop.permute.xlu0 %1735  ;;  %v2311_v23 = vpack.c.bf16 %v1708_v33, %v1688_v30  ;;  %v2367_v28 = vpack.c.bf16 %v1710_v9, %v1690_v25  ;;  %v2369_v49 = vpack.c.bf16 %v1709_v38, %v1689_v63  ;;  %v4249_v44 = vpack.c.bf16 %v4247_v14, %v4248_v52  ;;  %v2500_v9 = vld [vmem:[%s4118_s1 + $0xf0] sm:$0xff]  ;;  %v4251_v33 = vld [vmem:[#allocation16_spill] sm:$0xff]  ;;  %v4252_v25 = vld [vmem:[#allocation27_spill] sm:$0xff] }
 0x5bf   :  { %v1745_v22 = vsel %vm174_vm6, %v1736_v17, %v1738_v26  ;;  %v1759_v30 = vmul.f32 %v2499_v53, %v4250_v5  ;;  %v1761_v37 = vmul.f32 %v2500_v9, %v4251_v33  ;;  %v4254_v38 = vpack.c.bf16 %v4252_v25, %v4253_v4  ;;  %v4255_v55 = vld [vmem:[#allocation36_spill] sm:$0xff]  ;;  %v4268_v52 = vld [vmem:[#allocation43_spill] sm:$0xff] }
 0x5c0   :  { %2310 = vmatpush1.bf16.msra.mxu0 %v4237_v50  ;;  %v1747_v13 = vmul.f32 %v2498_v41, %v1745_v22 }
 0x5c1   :  { %2312 = vmatprep.subr.bf16.mxu0 %v2311_v23  ;;  %2366 = vmatpush1.bf16.msra.mxu1 %v4238_v18 }
 0x5c2   :  { %v1742_v54 = vpop.permute.xlu1 %1741  ;;  %2368 = vmatprep.subr.bf16.mxu1 %v2367_v28  ;;  %v1740_v21 = vpop.permute.xlu0 %1739  ;;  %v2321_v56 = vpack.c.bf16 %v1759_v30, %v1747_v13  ;;  %v4261_v13 = vld [vmem:[#allocation39_spill] sm:$0xff] }
 0x5c3   :  { %v1746_v46 = vsel %vm174_vm6, %v1742_v54, %v1736_v17  ;;  %v1743_v40 = vsel %vm174_vm6, %v1740_v21, %v1742_v54  ;;  %v1744_v11 = vsel %vm174_vm6, %v1738_v26, %v1740_v21  ;;  %v4256_v17 = vld [vmem:[#allocation34_spill] sm:$0xff]  ;;  %v1769_v21 = vmul.f32 %v2500_v9, %v3599_v48 }
 0x5c4   :  { %v1750_v24 = vmul.f32 %v4240_v0, %v1746_v46  ;;  %v1748_v7 = vmul.f32 %v4241_v19, %v1744_v11  ;;  %2314 = vmatpush1.bf16.msra.mxu0 %v2313_v10  ;;  %v1749_v12 = vmul.f32 %v4246_v31, %v1743_v40  ;;  %v4257_v23 = vpack.c.bf16 %v4255_v55, %v4256_v17  ;;  %v4258_v46 = vld [vmem:[#allocation37_spill] sm:$0xff]  ;;  %v4265_v31 = vld [vmem:[#allocation40_spill] sm:$0xff] }
 0x5c5   :  { %2316 = vmatprep.subr.bf16.mxu0 %v4244_v62  ;;  %2370 = vmatpush1.bf16.msra.mxu1 %v2369_v49  ;;  %v1767_v40 = vmul.f32 %v2499_v53, %v4258_v46  ;;  %v4263_v45 = vpack.c.bf16 %v4261_v13, %v4262_v36 }
 0x5c6   :  { %v1778_v29 = vpop.permute.xlu1 %1777  ;;  %2372 = vmatprep.subr.bf16.mxu1 %v4249_v44  ;;  %v1776_v1 = vpop.permute.xlu0 %1775  ;;  %v2319_v34 = vpack.c.bf16 %v1760_v47, %v1748_v7  ;;  %v2375_v26 = vpack.c.bf16 %v1762_v57, %v1750_v24  ;;  %v2377_v63 = vpack.c.bf16 %v1761_v37, %v1749_v12 }
 0x5c7   :  { %v1785_v39 = vsel %vm199_vm5, %v1776_v1, %v1778_v29 }
 0x5c8   :  { %2318 = vmatpush1.bf16.msra.mxu0 %v4254_v38  ;;  %v1787_v18 = vmul.f32 %v2499_v53, %v1785_v39 }
 0x5c9   :  { %2320 = vmatprep.subr.bf16.mxu0 %v2319_v34  ;;  %2374 = vmatpush1.bf16.msra.mxu1 %v4257_v23  ;;  %v4270_v34 = vld [vmem:[#allocation45_spill] sm:$0xff] }
 0x5ca   :  { %v1782_v50 = vpop.permute.xlu1 %1781  ;;  %2376 = vmatprep.subr.bf16.mxu1 %v2375_v26  ;;  %v1780_v28 = vpop.permute.xlu0 %1779  ;;  %v2325_v19 = vpack.c.bf16 %v1787_v18, %v1767_v40 }
 0x5cb   :  { %v1786_v10 = vsel %vm199_vm5, %v1782_v50, %v1776_v1  ;;  %v1783_v49 = vsel %vm199_vm5, %v1780_v28, %v1782_v50  ;;  %v1784_v54 = vsel %vm199_vm5, %v1778_v29, %v1780_v28  ;;  %v4267_v29 = vld [vmem:[#allocation42_spill] sm:$0xff] }
 0x5cc   :  { %v1790_v16 = vmul.f32 %v2497_v27, %v1786_v10  ;;  %v1788_v22 = vmul.f32 %v2496_v20, %v1784_v54  ;;  %v1789_v2 = vmul.f32 %v2500_v9, %v1783_v49  ;;  %2322 = vmatpush1.bf16.msra.mxu0 %v2321_v56  ;;  %v4259_v20 = vpack.c.bf16 %v3679_v35, %v3664_v6 }
 0x5cd   :  { %2378 = vmatpush1.bf16.msra.mxu1 %v2377_v63 }
 0x5ce   :  { %v2381_v11 = vpack.c.bf16 %v1789_v2, %v1769_v21  ;;  %v1818_v3 = vpop.permute.xlu1 %1817  ;;  %v1816_v47 = vpop.permute.xlu0 %1815  ;;  %v2323_v0 = vpack.c.bf16 %v1788_v22, %v1768_v15  ;;  %v2379_v24 = vpack.c.bf16 %v1790_v16, %v1770_v58 }
 0x5cf   :  { %v1825_v7 = vsel %vm224_vm7, %v1816_v47, %v1818_v3 }
 0x5d0   :  { %2324 = vmatprep.subr.bf16.mxu0 %v2323_v0  ;;  %2380 = vmatprep.subr.bf16.mxu1 %v2379_v24  ;;  %v1827_v62 = vmul.f32 %v3613_v43, %v1825_v7  ;;  %v4264_v43 = vld [vmem:[#allocation41_spill] sm:$0xff] }
 0x5d1   :  { %2326 = vmatpush1.bf16.msra.mxu0 %v2325_v19  ;;  %2382 = vmatpush1.bf16.msra.mxu1 %v2381_v11  ;;  %v4266_v12 = vpack.c.bf16 %v4264_v43, %v4265_v31 }
 0x5d2   :  { %v1822_v48 = vpop.permute.xlu1 %1821  ;;  %2384 = vmatprep.subr.bf16.mxu1 %v4259_v20  ;;  %v1820_v60 = vpop.permute.xlu0 %1819  ;;  %2328 = vmatprep.subr.bf16.mxu0 %v4260_v59 }
 0x5d3   :  { %v1826_v27 = vsel %vm224_vm7, %v1822_v48, %v1816_v47  ;;  %v1823_v42 = vsel %vm224_vm7, %v1820_v60, %v1822_v48  ;;  %v1824_v57 = vsel %vm224_vm7, %v1818_v3, %v1820_v60 }
 0x5d4   :  { %v1830_v41 = vmul.f32 %v3660_v51, %v1826_v27  ;;  %v1828_v6 = vmul.f32 %v3642_v32, %v1824_v57  ;;  %v1829_v35 = vmul.f32 %v3684_v61, %v1823_v42  ;;  %v2333_v51 = vpack.c.bf16 %v4270_v34, %v1827_v62  ;;  %v1839_v32 = vld [vmem:[%s4122_s5] sm:$0xff] }
 0x5d5   :  { %2330 = vmatpush1.bf16.msra.mxu0 %v4263_v45  ;;  %2386 = vmatpush1.bf16.msra.mxu1 %v4266_v12 }
 0x5d6   :  { %v2389_v14 = vpack.c.bf16 %v4267_v29, %v1829_v35  ;;  %v2331_v44 = vpack.c.bf16 %v4268_v52, %v1828_v6  ;;  %v2387_v1 = vpack.c.bf16 %v4269_v8, %v1830_v41 }
 0x5d8   :  { %2332 = vmatprep.subr.bf16.mxu0 %v2331_v44  ;;  %2388 = vmatprep.subr.bf16.mxu1 %v2387_v1 }
 0x5d9   :  { %2334 = vmatpush1.bf16.msra.mxu0 %v2333_v51  ;;  %2390 = vmatpush1.bf16.msra.mxu1 %v2389_v14 }
 0x5dc   :  { %2022 = vmatmul.mubr.f32.vlgmr.msra.gmra.mrb[6].mxu0 %v1839_v32  ;;  %2093 = vmatmul.mubr.f32.vlgmr.msra.gmra.mrb[6].mxu1 %v1839_v32 }
 0x6af   :  { %v2023_v61 = vpop.f32.mrb[6].mxu0  ;;  %v2094_v53 = vpop.f32.mrb[6].mxu1 }
 0x6b0   :  { %v2155_v5 = vmul.f32 -1.442695, %v2023_v61  ;;  %v2157_v30 = vmul.f32 -1.442695, %v2094_v53  ;;  %v2025_v9 = vpop.f32.mrb[7].mxu0  ;;  %v2096_v33 = vpop.f32.mrb[7].mxu1 }
 0x6b1   :  { %v2156_v37 = vmul.f32 -1.442695, %v2025_v9  ;;  %v2158_v39 = vmul.f32 -1.442695, %v2096_v33 }
 0x6b2   :  { %2449 = vpow2.f32 %v2155_v5 }
 0x6b3   :  { %2451 = vpow2.f32 %v2157_v30 }
 0x6b4   :  { %2453 = vpow2.f32 %v2156_v37 }
 0x6b5   :  { %2455 = vpow2.f32 %v2158_v39 }
 0x6bc   :  { %v2450_v25 = vpop.eup %2449 }
 0x6bd   :  { %v2452_v4 = vpop.eup %2451  ;;  %v2111_v38 = vadd.f32 1.0, %v2450_v25 }
 0x6be   :  { %v2454_v26 = vpop.eup %2453  ;;  %v2113_v55 = vadd.f32 1.0, %v2452_v4 }
 0x6bf   :  { %v2456_v17 = vpop.eup %2455  ;;  %2457 = vrcp.f32 %v2111_v38  ;;  %v2112_v23 = vadd.f32 1.0, %v2454_v26 }
 0x6c0   :  { %2459 = vrcp.f32 %v2113_v55  ;;  %v2114_v58 = vadd.f32 1.0, %v2456_v17 }
 0x6c1   :  { %2461 = vrcp.f32 %v2112_v23 }
 0x6c2   :  { %2463 = vrcp.f32 %v2114_v58 }
 0x6c9   :  { %v2458_v15 = vpop.eup %2457 }
 0x6ca   :  { %v2460_v56 = vpop.eup %2459  ;;  %v2123_v63 = vmul.f32 %v2458_v15, %v2023_v61 }
 0x6cb   :  { %v2462_v50 = vpop.eup %2461  ;;  %v2125_v28 = vmul.f32 %v2460_v56, %v2094_v53 }
 0x6cc   :  { %v2464_v18 = vpop.eup %2463  ;;  %2127 = vst [vmem:[%s4123_s6] sm:$0xff] %v2123_v63  ;;  %v2124_v10 = vmul.f32 %v2462_v50, %v2025_v9 }
 0x6cd   :  { %2129 = vst [vmem:[%s4123_s6 + $0x10] sm:$0xff] %v2125_v28  ;;  %v2126_v49 = vmul.f32 %v2464_v18, %v2096_v33 }
 0x6ce   :  { %2128 = vst [vmem:[%s4123_s6 + $0x8] sm:$0xff] %v2124_v10 }
 0x6cf   :  { %2130 = vst [vmem:[%s4123_s6 + $0x18] sm:$0xff] %v2126_v49 }

</bundles_post_ra>
